<compile_context>
chip_gen: v6e
topology: v6e:2x2x1
jax: 0.10.0
libtpu: 0.0.40
codegen_flags: <defaults>
</compile_context>

<pallas_src>
import math
import functools

import jax
import jax.numpy as jnp
from jax.experimental import pallas as pl
from jax.experimental.pallas import tpu as pltpu


# ----------------------------- config (small test sizes) -----------------------------
BATCH = 2
SEQ_LEN = 16
D_MODEL = 32
N_HEADS = 4
D_FF = 64
LN_EPS = 1e-6


# ----------------------------------- Pallas kernel -----------------------------------
def _layernorm(y, g, b, eps):
    # Annotated-transformer LayerNorm: unbiased std (N-1), eps added to the *std*.
    feat = y.shape[-1]
    mean = jnp.mean(y, axis=-1, keepdims=True)
    diff = y - mean
    var_unbiased = jnp.sum(diff * diff, axis=-1, keepdims=True) * (1.0 / float(feat - 1))
    std = jnp.sqrt(var_unbiased)
    # exact divide (not approx reciprocal) -- LN feeds every matmul.
    return g * (diff / (std + eps)) + b


def _encoder_layer_kernel(x_ref, w_ref, w2_ref, vec_ref, o_ref, *,
                          n_heads, n_batch, eps):
    x = x_ref[...]                                  # [R, D], R = B*T rows (all batches fused)
    R, D = x.shape
    T = R // n_batch
    dk = D // n_heads
    d_ff = w2_ref.shape[0]

    # ---- unpack packed weight / vector slabs with static slices ---------------------
    w = w_ref[...]                                  # [D, 3D + D + D_FF]
    wqkv = w[:, 0:3 * D]                            # scale folded into Wq columns
    wo = w[:, 3 * D:4 * D]
    w1 = w[:, 4 * D:4 * D + d_ff]

    vecs = vec_ref[...]                             # [8, max(3D, D_FF)]
    bqkv = vecs[0:1, 0:3 * D]
    bo = vecs[1:2, 0:D]
    b1 = vecs[2:3, 0:d_ff]
    b2 = vecs[3:4, 0:D]
    g0 = vecs[4:5, 0:D]
    be0 = vecs[5:6, 0:D]
    g1 = vecs[6:7, 0:D]
    be1 = vecs[7:8, 0:D]

    # ---- sublayer 0: pre-norm + multi-head self-attention + residual ----------------
    xn = _layernorm(x, g0, be0, eps)
    qkv = jnp.dot(xn, wqkv, preferred_element_type=jnp.float32) + bqkv     # [R, 3D]
    q = qkv[:, 0:D]                                 # 1/sqrt(dk) already folded into Wq/bq
    k = qkv[:, D:2 * D]
    v = qkv[:, 2 * D:3 * D]

    head_outs = []
    for h in range(n_heads):                        # static unrolled loop over heads
        sl = slice(h * dk, (h + 1) * dk)
        # leading-dim split only (no lane-dim reshape): [R, dk] -> [B, T, dk]
        qh = q[:, sl].reshape(n_batch, T, dk)
        kh = k[:, sl].reshape(n_batch, T, dk)
        vh = v[:, sl].reshape(n_batch, T, dk)
        s = jnp.einsum("bqd,bkd->bqk", qh, kh,
                       preferred_element_type=jnp.float32)                # [B, T, T]
        s = s - jnp.max(s, axis=-1, keepdims=True)
        p = jnp.exp(s)
        p = p * pl.reciprocal(jnp.sum(p, axis=-1, keepdims=True), approx=True)
        oh = jnp.einsum("bqk,bkd->bqd", p, vh,
                        preferred_element_type=jnp.float32)               # [B, T, dk]
        head_outs.append(oh.reshape(R, dk))
    attn = jnp.concatenate(head_outs, axis=-1)                            # [R, D]
    # one wide output-projection matmul (K = D) instead of per-head folded accumulation
    x1 = x + jnp.dot(attn, wo, preferred_element_type=jnp.float32) + bo   # dropout = identity

    # ---- sublayer 1: pre-norm + position-wise feed forward + residual ---------------
    xn1 = _layernorm(x1, g1, be1, eps)
    hid = jnp.maximum(
        jnp.dot(xn1, w1, preferred_element_type=jnp.float32) + b1, 0.0)
    ff = jnp.dot(hid, w2_ref[...], preferred_element_type=jnp.float32) + b2
    o_ref[...] = (x1 + ff).astype(o_ref.dtype)      # dropout = identity (eval mode)


# --------------------------------- wrapper / launch -----------------------------------
def encoder_layer_forward(x, params, *, n_heads=N_HEADS, eps=LN_EPS):
    B, T, D = x.shape
    dk = D // n_heads
    d_ff = params["ff_w1"].shape[1]
    scale = 1.0 / math.sqrt(dk)

    # Pack all matrix weights with D rows into one slab; fold attention scale into Wq/bq.
    w_slab = jnp.concatenate(
        [params["wq"] * scale, params["wk"], params["wv"], params["wo"], params["ff_w1"]],
        axis=1)                                                   # [D, 3D + D + D_FF]
    w2 = params["ff_w2"]                                          # [D_FF, D]

    # Pack all bias / LayerNorm vectors into one padded [8, max(3D, D_FF)] slab.
    bqkv = jnp.concatenate([params["bq"] * scale, params["bk"], params["bv"]], axis=0)
    vw = max(3 * D, d_ff)

    def row(v):
        return jnp.pad(v, (0, vw - v.shape[0]))

    vec_slab = jnp.stack(
        [row(bqkv), row(params["bo"]), row(params["ff_b1"]), row(params["ff_b2"]),
         row(params["ln0_g"]), row(params["ln0_b"]), row(params["ln1_g"]), row(params["ln1_b"])],
        axis=0)

    # Present the activation as a single lane/sublane-dense (B*T, D) slab; no grid
    # (single invocation -- per-grid-step overhead dominates at this size).
    x2 = x.reshape(B * T, D)
    vmem = pl.BlockSpec(memory_space=pltpu.MemorySpace.VMEM)

    out = pl.pallas_call(
        functools.partial(_encoder_layer_kernel, n_heads=n_heads, n_batch=B, eps=eps),
        out_shape=jax.ShapeDtypeStruct((B * T, D), jnp.float32),
        in_specs=[vmem, vmem, vmem, vmem],
        out_specs=vmem,
        compiler_params=pltpu.CompilerParams(vmem_limit_bytes=32 * 1024 * 1024),
    )(x2, w_slab, w2, vec_slab)
    return out.reshape(B, T, D)


# ----------------------------- pure-JAX reference (check) -----------------------------
def encoder_layer_reference(x, params, *, n_heads=N_HEADS, eps=LN_EPS):
    def ln(y, g, b):
        mean = y.mean(-1, keepdims=True)
        diff = y - mean
        std = jnp.sqrt((diff * diff).sum(-1, keepdims=True) / (y.shape[-1] - 1))
        return g * diff / (std + eps) + b

    def lin(y, w, b):
        return y @ w + b

    B, T, D = x.shape
    dk = D // n_heads

    def split(y):
        return y.reshape(B, T, n_heads, dk).transpose(0, 2, 1, 3)

    xn = ln(x, params["ln0_g"], params["ln0_b"])
    q = split(lin(xn, params["wq"], params["bq"]))
    k = split(lin(xn, params["wk"], params["bk"]))
    v = split(lin(xn, params["wv"], params["bv"]))
    s = jnp.einsum("bhqd,bhkd->bhqk", q, k) / math.sqrt(dk)
    p = jax.nn.softmax(s, axis=-1)
    o = jnp.einsum("bhqk,bhkd->bhqd", p, v).transpose(0, 2, 1, 3).reshape(B, T, D)
    x1 = x + lin(o, params["wo"], params["bo"])
    xn1 = ln(x1, params["ln1_g"], params["ln1_b"])
    h = jnp.maximum(lin(xn1, params["ff_w1"], params["ff_b1"]), 0.0)
    return x1 + lin(h, params["ff_w2"], params["ff_b2"])


# ------------------------------- deterministic params ---------------------------------
def init_params(key):
    def lin(k, fan_in, fan_out):
        kw, kb = jax.random.split(k)
        w = jax.random.normal(kw, (fan_in, fan_out), jnp.float32) * 0.05
        b = jax.random.normal(kb, (fan_out,), jnp.float32) * 0.01
        return w, b

    ks = jax.random.split(key, 10)
    p = {}
    p["wq"], p["bq"] = lin(ks[0], D_MODEL, D_MODEL)
    p["wk"], p["bk"] = lin(ks[1], D_MODEL, D_MODEL)
    p["wv"], p["bv"] = lin(ks[2], D_MODEL, D_MODEL)
    p["wo"], p["bo"] = lin(ks[3], D_MODEL, D_MODEL)
    p["ff_w1"], p["ff_b1"] = lin(ks[4], D_MODEL, D_FF)
    p["ff_w2"], p["ff_b2"] = lin(ks[5], D_FF, D_MODEL)
    # independent keys so gamma/beta paths are independently exercised
    p["ln0_g"] = 1.0 + 0.1 * jax.random.normal(ks[6], (D_MODEL,), jnp.float32)
    p["ln0_b"] = 0.1 * jax.random.normal(ks[7], (D_MODEL,), jnp.float32)
    p["ln1_g"] = 1.0 + 0.1 * jax.random.normal(ks[8], (D_MODEL,), jnp.float32)
    p["ln1_b"] = 0.1 * jax.random.normal(ks[9], (D_MODEL,), jnp.float32)
    return p


# -------------------------------------- main -------------------------------------------
if __name__ == "__main__":
    root = jax.random.PRNGKey(0)
    k_params, k_x = jax.random.split(root)

    params = init_params(k_params)
    x = jax.random.normal(k_x, (BATCH, SEQ_LEN, D_MODEL), jnp.float32)

    fwd = jax.jit(encoder_layer_forward)
    out = fwd(x, params)
    jax.block_until_ready(out)

    ref = encoder_layer_reference(x, params)
    assert out.shape == (BATCH, SEQ_LEN, D_MODEL)
    max_err = float(jnp.max(jnp.abs(out - ref)))
    assert max_err < 1e-2, f"max abs error vs reference: {max_err}"
    print("KERNEL_OK")
</pallas_src>

<mosaic_0001>
module attributes {stable_mosaic.version = 11 : i64} {
  func.func @_encoder_layer_kernel(%arg0: memref<32x32xf32, #tpu.memory_space<vmem>>, %arg1: memref<32x192xf32, #tpu.memory_space<vmem>>, %arg2: memref<64x32xf32, #tpu.memory_space<vmem>>, %arg3: memref<8x96xf32, #tpu.memory_space<vmem>>, %arg4: memref<32x32xf32, #tpu.memory_space<vmem>>) attributes {dimension_semantics = [], scalar_prefetch = 0 : i64, scratch_operands = 0 : i64, tpu.core_type = #tpu.core_type<tc>} {
    %c0 = arith.constant 0 : index
    %c0_0 = arith.constant 0 : index
    %0 = vector.load %arg0[%c0, %c0_0] : memref<32x32xf32, #tpu.memory_space<vmem>>, vector<32x32xf32>
    %c0_1 = arith.constant 0 : index
    %c0_2 = arith.constant 0 : index
    %1 = vector.load %arg1[%c0_1, %c0_2] : memref<32x192xf32, #tpu.memory_space<vmem>>, vector<32x192xf32>
    %2 = vector.extract_strided_slice %1 {offsets = [0, 0], sizes = [32, 96], strides = [1, 1]} : vector<32x192xf32> to vector<32x96xf32>
    %3 = vector.extract_strided_slice %1 {offsets = [0, 96], sizes = [32, 32], strides = [1, 1]} : vector<32x192xf32> to vector<32x32xf32>
    %4 = vector.extract_strided_slice %1 {offsets = [0, 128], sizes = [32, 64], strides = [1, 1]} : vector<32x192xf32> to vector<32x64xf32>
    %c0_3 = arith.constant 0 : index
    %c0_4 = arith.constant 0 : index
    %5 = vector.load %arg3[%c0_3, %c0_4] : memref<8x96xf32, #tpu.memory_space<vmem>>, vector<8x96xf32>
    %6 = vector.extract_strided_slice %5 {offsets = [0, 0], sizes = [1, 96], strides = [1, 1]} : vector<8x96xf32> to vector<1x96xf32>
    %7 = vector.extract_strided_slice %5 {offsets = [1, 0], sizes = [1, 32], strides = [1, 1]} : vector<8x96xf32> to vector<1x32xf32>
    %8 = vector.extract_strided_slice %5 {offsets = [2, 0], sizes = [1, 64], strides = [1, 1]} : vector<8x96xf32> to vector<1x64xf32>
    %9 = vector.extract_strided_slice %5 {offsets = [3, 0], sizes = [1, 32], strides = [1, 1]} : vector<8x96xf32> to vector<1x32xf32>
    %10 = vector.extract_strided_slice %5 {offsets = [4, 0], sizes = [1, 32], strides = [1, 1]} : vector<8x96xf32> to vector<1x32xf32>
    %11 = vector.extract_strided_slice %5 {offsets = [5, 0], sizes = [1, 32], strides = [1, 1]} : vector<8x96xf32> to vector<1x32xf32>
    %12 = vector.extract_strided_slice %5 {offsets = [6, 0], sizes = [1, 32], strides = [1, 1]} : vector<8x96xf32> to vector<1x32xf32>
    %13 = vector.extract_strided_slice %5 {offsets = [7, 0], sizes = [1, 32], strides = [1, 1]} : vector<8x96xf32> to vector<1x32xf32>
    %cst = arith.constant dense<0.000000e+00> : vector<32xf32>
    %14 = vector.multi_reduction <add>, %0, %cst [1] : vector<32x32xf32> to vector<32xf32>
    %15 = vector.shape_cast %14 : vector<32xf32> to vector<32x1xf32>
    %cst_5 = arith.constant 3.200000e+01 : f32
    %16 = vector.broadcast %cst_5 : f32 to vector<32x1xf32>
    %17 = arith.divf %15, %16 : vector<32x1xf32>
    %18 = vector.broadcast %17 : vector<32x1xf32> to vector<32x32xf32>
    %19 = arith.subf %0, %18 : vector<32x32xf32>
    %20 = arith.mulf %19, %19 : vector<32x32xf32>
    %cst_6 = arith.constant dense<0.000000e+00> : vector<32xf32>
    %21 = vector.multi_reduction <add>, %20, %cst_6 [1] : vector<32x32xf32> to vector<32xf32>
    %22 = vector.shape_cast %21 : vector<32xf32> to vector<32x1xf32>
    %cst_7 = arith.constant 0.0322580636 : f32
    %23 = vector.broadcast %cst_7 : f32 to vector<32x1xf32>
    %24 = arith.mulf %22, %23 : vector<32x1xf32>
    %25 = math.sqrt %24 : vector<32x1xf32>
    %cst_8 = arith.constant 9.99999997E-7 : f32
    %26 = vector.broadcast %cst_8 : f32 to vector<32x1xf32>
    %27 = arith.addf %25, %26 : vector<32x1xf32>
    %28 = vector.broadcast %27 : vector<32x1xf32> to vector<32x32xf32>
    %29 = arith.divf %19, %28 : vector<32x32xf32>
    %30 = vector.broadcast %10 : vector<1x32xf32> to vector<32x32xf32>
    %31 = arith.mulf %30, %29 : vector<32x32xf32>
    %32 = vector.broadcast %11 : vector<1x32xf32> to vector<32x32xf32>
    %33 = arith.addf %31, %32 : vector<32x32xf32>
    %cst_9 = arith.constant dense<0.000000e+00> : vector<32x96xf32>
    %34 = tpu.matmul %33, %2, %cst_9 {dimension_numbers = #tpu.dot_dimension_numbers<[1], [0], [0], [1], [0, 0, 1, 1], [], []>} : vector<32x32xf32>, vector<32x96xf32>, vector<32x96xf32> -> vector<32x96xf32>
    %35 = vector.broadcast %6 : vector<1x96xf32> to vector<32x96xf32>
    %36 = arith.addf %34, %35 : vector<32x96xf32>
    %37 = vector.extract_strided_slice %36 {offsets = [0, 0], sizes = [32, 32], strides = [1, 1]} : vector<32x96xf32> to vector<32x32xf32>
    %38 = vector.extract_strided_slice %36 {offsets = [0, 32], sizes = [32, 32], strides = [1, 1]} : vector<32x96xf32> to vector<32x32xf32>
    %39 = vector.extract_strided_slice %36 {offsets = [0, 64], sizes = [32, 32], strides = [1, 1]} : vector<32x96xf32> to vector<32x32xf32>
    %40 = vector.extract_strided_slice %37 {offsets = [0, 0], sizes = [32, 8], strides = [1, 1]} : vector<32x32xf32> to vector<32x8xf32>
    %41 = vector.shape_cast %40 : vector<32x8xf32> to vector<2x16x8xf32>
    %42 = vector.extract_strided_slice %38 {offsets = [0, 0], sizes = [32, 8], strides = [1, 1]} : vector<32x32xf32> to vector<32x8xf32>
    %43 = vector.shape_cast %42 : vector<32x8xf32> to vector<2x16x8xf32>
    %44 = vector.extract_strided_slice %39 {offsets = [0, 0], sizes = [32, 8], strides = [1, 1]} : vector<32x32xf32> to vector<32x8xf32>
    %45 = vector.shape_cast %44 : vector<32x8xf32> to vector<2x16x8xf32>
    "tpu.trace_start"() <{level = 10 : i32, message = "bqd,bkd->bqk"}> : () -> ()
    %cst_10 = arith.constant dense<0.000000e+00> : vector<2x16x16xf32>
    %46 = tpu.matmul %41, %43, %cst_10 {dimension_numbers = #tpu.dot_dimension_numbers<[2], [2], [1], [1], [0, 0, 0, 1, 1, 1], [0], [0]>} : vector<2x16x8xf32>, vector<2x16x8xf32>, vector<2x16x16xf32> -> vector<2x16x16xf32>
    "tpu.trace_stop"() : () -> ()
    %cst_11 = arith.constant dense<0xFF800000> : vector<2x16xf32>
    %47 = vector.multi_reduction <maximumf>, %46, %cst_11 [2] : vector<2x16x16xf32> to vector<2x16xf32>
    %48 = vector.shape_cast %47 : vector<2x16xf32> to vector<2x16x1xf32>
    %49 = vector.broadcast %48 : vector<2x16x1xf32> to vector<2x16x16xf32>
    %50 = arith.subf %46, %49 : vector<2x16x16xf32>
    %51 = math.exp %50 : vector<2x16x16xf32>
    %cst_12 = arith.constant dense<0.000000e+00> : vector<2x16xf32>
    %52 = vector.multi_reduction <add>, %51, %cst_12 [2] : vector<2x16x16xf32> to vector<2x16xf32>
    %53 = vector.shape_cast %52 : vector<2x16xf32> to vector<2x16x1xf32>
    %54 = tpu.reciprocal %53 {approx = true} : vector<2x16x1xf32> -> vector<2x16x1xf32>
    %55 = vector.broadcast %54 : vector<2x16x1xf32> to vector<2x16x16xf32>
    %56 = arith.mulf %51, %55 : vector<2x16x16xf32>
    "tpu.trace_start"() <{level = 10 : i32, message = "bqk,bkd->bqd"}> : () -> ()
    %cst_13 = arith.constant dense<0.000000e+00> : vector<2x16x8xf32>
    %57 = tpu.matmul %56, %45, %cst_13 {dimension_numbers = #tpu.dot_dimension_numbers<[2], [1], [1], [2], [0, 0, 0, 1, 1, 2], [0], [0]>} : vector<2x16x16xf32>, vector<2x16x8xf32>, vector<2x16x8xf32> -> vector<2x16x8xf32>
    "tpu.trace_stop"() : () -> ()
    %58 = vector.shape_cast %57 : vector<2x16x8xf32> to vector<32x8xf32>
    %59 = vector.extract_strided_slice %37 {offsets = [0, 8], sizes = [32, 8], strides = [1, 1]} : vector<32x32xf32> to vector<32x8xf32>
    %60 = vector.shape_cast %59 : vector<32x8xf32> to vector<2x16x8xf32>
    %61 = vector.extract_strided_slice %38 {offsets = [0, 8], sizes = [32, 8], strides = [1, 1]} : vector<32x32xf32> to vector<32x8xf32>
    %62 = vector.shape_cast %61 : vector<32x8xf32> to vector<2x16x8xf32>
    %63 = vector.extract_strided_slice %39 {offsets = [0, 8], sizes = [32, 8], strides = [1, 1]} : vector<32x32xf32> to vector<32x8xf32>
    %64 = vector.shape_cast %63 : vector<32x8xf32> to vector<2x16x8xf32>
    "tpu.trace_start"() <{level = 10 : i32, message = "bqd,bkd->bqk"}> : () -> ()
    %cst_14 = arith.constant dense<0.000000e+00> : vector<2x16x16xf32>
    %65 = tpu.matmul %60, %62, %cst_14 {dimension_numbers = #tpu.dot_dimension_numbers<[2], [2], [1], [1], [0, 0, 0, 1, 1, 1], [0], [0]>} : vector<2x16x8xf32>, vector<2x16x8xf32>, vector<2x16x16xf32> -> vector<2x16x16xf32>
    "tpu.trace_stop"() : () -> ()
    %cst_15 = arith.constant dense<0xFF800000> : vector<2x16xf32>
    %66 = vector.multi_reduction <maximumf>, %65, %cst_15 [2] : vector<2x16x16xf32> to vector<2x16xf32>
    %67 = vector.shape_cast %66 : vector<2x16xf32> to vector<2x16x1xf32>
    %68 = vector.broadcast %67 : vector<2x16x1xf32> to vector<2x16x16xf32>
    %69 = arith.subf %65, %68 : vector<2x16x16xf32>
    %70 = math.exp %69 : vector<2x16x16xf32>
    %cst_16 = arith.constant dense<0.000000e+00> : vector<2x16xf32>
    %71 = vector.multi_reduction <add>, %70, %cst_16 [2] : vector<2x16x16xf32> to vector<2x16xf32>
    %72 = vector.shape_cast %71 : vector<2x16xf32> to vector<2x16x1xf32>
    %73 = tpu.reciprocal %72 {approx = true} : vector<2x16x1xf32> -> vector<2x16x1xf32>
    %74 = vector.broadcast %73 : vector<2x16x1xf32> to vector<2x16x16xf32>
    %75 = arith.mulf %70, %74 : vector<2x16x16xf32>
    "tpu.trace_start"() <{level = 10 : i32, message = "bqk,bkd->bqd"}> : () -> ()
    %cst_17 = arith.constant dense<0.000000e+00> : vector<2x16x8xf32>
    %76 = tpu.matmul %75, %64, %cst_17 {dimension_numbers = #tpu.dot_dimension_numbers<[2], [1], [1], [2], [0, 0, 0, 1, 1, 2], [0], [0]>} : vector<2x16x16xf32>, vector<2x16x8xf32>, vector<2x16x8xf32> -> vector<2x16x8xf32>
    "tpu.trace_stop"() : () -> ()
    %77 = vector.shape_cast %76 : vector<2x16x8xf32> to vector<32x8xf32>
    %78 = vector.extract_strided_slice %37 {offsets = [0, 16], sizes = [32, 8], strides = [1, 1]} : vector<32x32xf32> to vector<32x8xf32>
    %79 = vector.shape_cast %78 : vector<32x8xf32> to vector<2x16x8xf32>
    %80 = vector.extract_strided_slice %38 {offsets = [0, 16], sizes = [32, 8], strides = [1, 1]} : vector<32x32xf32> to vector<32x8xf32>
    %81 = vector.shape_cast %80 : vector<32x8xf32> to vector<2x16x8xf32>
    %82 = vector.extract_strided_slice %39 {offsets = [0, 16], sizes = [32, 8], strides = [1, 1]} : vector<32x32xf32> to vector<32x8xf32>
    %83 = vector.shape_cast %82 : vector<32x8xf32> to vector<2x16x8xf32>
    "tpu.trace_start"() <{level = 10 : i32, message = "bqd,bkd->bqk"}> : () -> ()
    %cst_18 = arith.constant dense<0.000000e+00> : vector<2x16x16xf32>
    %84 = tpu.matmul %79, %81, %cst_18 {dimension_numbers = #tpu.dot_dimension_numbers<[2], [2], [1], [1], [0, 0, 0, 1, 1, 1], [0], [0]>} : vector<2x16x8xf32>, vector<2x16x8xf32>, vector<2x16x16xf32> -> vector<2x16x16xf32>
    "tpu.trace_stop"() : () -> ()
    %cst_19 = arith.constant dense<0xFF800000> : vector<2x16xf32>
    %85 = vector.multi_reduction <maximumf>, %84, %cst_19 [2] : vector<2x16x16xf32> to vector<2x16xf32>
    %86 = vector.shape_cast %85 : vector<2x16xf32> to vector<2x16x1xf32>
    %87 = vector.broadcast %86 : vector<2x16x1xf32> to vector<2x16x16xf32>
    %88 = arith.subf %84, %87 : vector<2x16x16xf32>
    %89 = math.exp %88 : vector<2x16x16xf32>
    %cst_20 = arith.constant dense<0.000000e+00> : vector<2x16xf32>
    %90 = vector.multi_reduction <add>, %89, %cst_20 [2] : vector<2x16x16xf32> to vector<2x16xf32>
    %91 = vector.shape_cast %90 : vector<2x16xf32> to vector<2x16x1xf32>
    %92 = tpu.reciprocal %91 {approx = true} : vector<2x16x1xf32> -> vector<2x16x1xf32>
    %93 = vector.broadcast %92 : vector<2x16x1xf32> to vector<2x16x16xf32>
    %94 = arith.mulf %89, %93 : vector<2x16x16xf32>
    "tpu.trace_start"() <{level = 10 : i32, message = "bqk,bkd->bqd"}> : () -> ()
    %cst_21 = arith.constant dense<0.000000e+00> : vector<2x16x8xf32>
    %95 = tpu.matmul %94, %83, %cst_21 {dimension_numbers = #tpu.dot_dimension_numbers<[2], [1], [1], [2], [0, 0, 0, 1, 1, 2], [0], [0]>} : vector<2x16x16xf32>, vector<2x16x8xf32>, vector<2x16x8xf32> -> vector<2x16x8xf32>
    "tpu.trace_stop"() : () -> ()
    %96 = vector.shape_cast %95 : vector<2x16x8xf32> to vector<32x8xf32>
    %97 = vector.extract_strided_slice %37 {offsets = [0, 24], sizes = [32, 8], strides = [1, 1]} : vector<32x32xf32> to vector<32x8xf32>
    %98 = vector.shape_cast %97 : vector<32x8xf32> to vector<2x16x8xf32>
    %99 = vector.extract_strided_slice %38 {offsets = [0, 24], sizes = [32, 8], strides = [1, 1]} : vector<32x32xf32> to vector<32x8xf32>
    %100 = vector.shape_cast %99 : vector<32x8xf32> to vector<2x16x8xf32>
    %101 = vector.extract_strided_slice %39 {offsets = [0, 24], sizes = [32, 8], strides = [1, 1]} : vector<32x32xf32> to vector<32x8xf32>
    %102 = vector.shape_cast %101 : vector<32x8xf32> to vector<2x16x8xf32>
    "tpu.trace_start"() <{level = 10 : i32, message = "bqd,bkd->bqk"}> : () -> ()
    %cst_22 = arith.constant dense<0.000000e+00> : vector<2x16x16xf32>
    %103 = tpu.matmul %98, %100, %cst_22 {dimension_numbers = #tpu.dot_dimension_numbers<[2], [2], [1], [1], [0, 0, 0, 1, 1, 1], [0], [0]>} : vector<2x16x8xf32>, vector<2x16x8xf32>, vector<2x16x16xf32> -> vector<2x16x16xf32>
    "tpu.trace_stop"() : () -> ()
    %cst_23 = arith.constant dense<0xFF800000> : vector<2x16xf32>
    %104 = vector.multi_reduction <maximumf>, %103, %cst_23 [2] : vector<2x16x16xf32> to vector<2x16xf32>
    %105 = vector.shape_cast %104 : vector<2x16xf32> to vector<2x16x1xf32>
    %106 = vector.broadcast %105 : vector<2x16x1xf32> to vector<2x16x16xf32>
    %107 = arith.subf %103, %106 : vector<2x16x16xf32>
    %108 = math.exp %107 : vector<2x16x16xf32>
    %cst_24 = arith.constant dense<0.000000e+00> : vector<2x16xf32>
    %109 = vector.multi_reduction <add>, %108, %cst_24 [2] : vector<2x16x16xf32> to vector<2x16xf32>
    %110 = vector.shape_cast %109 : vector<2x16xf32> to vector<2x16x1xf32>
    %111 = tpu.reciprocal %110 {approx = true} : vector<2x16x1xf32> -> vector<2x16x1xf32>
    %112 = vector.broadcast %111 : vector<2x16x1xf32> to vector<2x16x16xf32>
    %113 = arith.mulf %108, %112 : vector<2x16x16xf32>
    "tpu.trace_start"() <{level = 10 : i32, message = "bqk,bkd->bqd"}> : () -> ()
    %cst_25 = arith.constant dense<0.000000e+00> : vector<2x16x8xf32>
    %114 = tpu.matmul %113, %102, %cst_25 {dimension_numbers = #tpu.dot_dimension_numbers<[2], [1], [1], [2], [0, 0, 0, 1, 1, 2], [0], [0]>} : vector<2x16x16xf32>, vector<2x16x8xf32>, vector<2x16x8xf32> -> vector<2x16x8xf32>
    "tpu.trace_stop"() : () -> ()
    %115 = vector.shape_cast %114 : vector<2x16x8xf32> to vector<32x8xf32>
    %116 = tpu.concatenate %58, %77, %96, %115 in 1 : vector<32x8xf32>, vector<32x8xf32>, vector<32x8xf32>, vector<32x8xf32> -> vector<32x32xf32>
    %cst_26 = arith.constant dense<0.000000e+00> : vector<32x32xf32>
    %117 = tpu.matmul %116, %3, %cst_26 {dimension_numbers = #tpu.dot_dimension_numbers<[1], [0], [0], [1], [0, 0, 1, 1], [], []>} : vector<32x32xf32>, vector<32x32xf32>, vector<32x32xf32> -> vector<32x32xf32>
    %118 = arith.addf %0, %117 : vector<32x32xf32>
    %119 = vector.broadcast %7 : vector<1x32xf32> to vector<32x32xf32>
    %120 = arith.addf %118, %119 : vector<32x32xf32>
    %cst_27 = arith.constant dense<0.000000e+00> : vector<32xf32>
    %121 = vector.multi_reduction <add>, %120, %cst_27 [1] : vector<32x32xf32> to vector<32xf32>
    %122 = vector.shape_cast %121 : vector<32xf32> to vector<32x1xf32>
    %cst_28 = arith.constant 3.200000e+01 : f32
    %123 = vector.broadcast %cst_28 : f32 to vector<32x1xf32>
    %124 = arith.divf %122, %123 : vector<32x1xf32>
    %125 = vector.broadcast %124 : vector<32x1xf32> to vector<32x32xf32>
    %126 = arith.subf %120, %125 : vector<32x32xf32>
    %127 = arith.mulf %126, %126 : vector<32x32xf32>
    %cst_29 = arith.constant dense<0.000000e+00> : vector<32xf32>
    %128 = vector.multi_reduction <add>, %127, %cst_29 [1] : vector<32x32xf32> to vector<32xf32>
    %129 = vector.shape_cast %128 : vector<32xf32> to vector<32x1xf32>
    %cst_30 = arith.constant 0.0322580636 : f32
    %130 = vector.broadcast %cst_30 : f32 to vector<32x1xf32>
    %131 = arith.mulf %129, %130 : vector<32x1xf32>
    %132 = math.sqrt %131 : vector<32x1xf32>
    %cst_31 = arith.constant 9.99999997E-7 : f32
    %133 = vector.broadcast %cst_31 : f32 to vector<32x1xf32>
    %134 = arith.addf %132, %133 : vector<32x1xf32>
    %135 = vector.broadcast %134 : vector<32x1xf32> to vector<32x32xf32>
    %136 = arith.divf %126, %135 : vector<32x32xf32>
    %137 = vector.broadcast %12 : vector<1x32xf32> to vector<32x32xf32>
    %138 = arith.mulf %137, %136 : vector<32x32xf32>
    %139 = vector.broadcast %13 : vector<1x32xf32> to vector<32x32xf32>
    %140 = arith.addf %138, %139 : vector<32x32xf32>
    %cst_32 = arith.constant dense<0.000000e+00> : vector<32x64xf32>
    %141 = tpu.matmul %140, %4, %cst_32 {dimension_numbers = #tpu.dot_dimension_numbers<[1], [0], [0], [1], [0, 0, 1, 1], [], []>} : vector<32x32xf32>, vector<32x64xf32>, vector<32x64xf32> -> vector<32x64xf32>
    %142 = vector.broadcast %8 : vector<1x64xf32> to vector<32x64xf32>
    %143 = arith.addf %141, %142 : vector<32x64xf32>
    %cst_33 = arith.constant 0.000000e+00 : f32
    %144 = vector.broadcast %cst_33 : f32 to vector<32x64xf32>
    %145 = arith.maximumf %143, %144 : vector<32x64xf32>
    %c0_34 = arith.constant 0 : index
    %c0_35 = arith.constant 0 : index
    %146 = vector.load %arg2[%c0_34, %c0_35] : memref<64x32xf32, #tpu.memory_space<vmem>>, vector<64x32xf32>
    %cst_36 = arith.constant dense<0.000000e+00> : vector<32x32xf32>
    %147 = tpu.matmul %145, %146, %cst_36 {dimension_numbers = #tpu.dot_dimension_numbers<[1], [0], [0], [1], [0, 0, 1, 1], [], []>} : vector<32x64xf32>, vector<64x32xf32>, vector<32x32xf32> -> vector<32x32xf32>
    %148 = vector.broadcast %9 : vector<1x32xf32> to vector<32x32xf32>
    %149 = arith.addf %147, %148 : vector<32x32xf32>
    %150 = arith.addf %120, %149 : vector<32x32xf32>
    %c0_37 = arith.constant 0 : index
    %c0_38 = arith.constant 0 : index
    %151 = vector.load %arg4[%c0_37, %c0_38] : memref<32x32xf32, #tpu.memory_space<vmem>>, vector<32x32xf32>
    tpu.vector_store %arg4[%c0_37, %c0_38], %150 {strides = array<i32>} : memref<32x32xf32, #tpu.memory_space<vmem>>, vector<32x32xf32>,
    return
  }
}

</mosaic_0001>

<bundles_post_ra>
// kernel: encoder_layer_forward.1
= control target key start
LH: loop header
LB: loop body
LE: loop exit
PB: predicated region body
PF: predicated region fallthrough
CT: control target
= control target key end

     0   :  { %vm31_vm0 = vcmask 261120   ;;  %s3289_s0 = inlined_call_operand.vmem [shape: f32[32,32], index: 0, kind: input, shape index: {}]   ;;  %s3290_s1 = inlined_call_operand.vmem [shape: f32[32,192], index: 1, kind: input, shape index: {}]   ;;  %s3291_s2 = inlined_call_operand.vmem [shape: f32[64,32], index: 2, kind: input, shape index: {}]   ;;  %s3292_s3 = inlined_call_operand.vmem [shape: f32[8,96], index: 3, kind: input, shape index: {}]   ;;  %s3293_s4 = inlined_call_operand.hbm [shape: f32[32,32], index: 4, kind: output, shape index: {}]  }
   0x1   :  { %v18_v0 = vld [vmem:[%s3289_s0] sm:$0xff]  ;;  %v20_v1 = vld [vmem:[%s3289_s0 + $0x10] sm:$0xff]  ;;  %v19_v2 = vld [vmem:[%s3289_s0 + $0x8] sm:$0xff] }
   0x2   :  { %v32_v3 = vsel %vm31_vm0, %v18_v0, 0.0  ;;  %v38_v4 = vsel %vm31_vm0, %v20_v1, 0.0  ;;  %v21_v5 = vld [vmem:[%s3289_s0 + $0x18] sm:$0xff] }
   0x3   :  { %9 = vsyncpa [#allocation3], 0  ;;  %33 = vadd.xlane.f32.xlu0 %v32_v3  ;;  %39 = vadd.xlane.f32.xlu1 %v38_v4  ;;  %v35_v6 = vsel %vm31_vm0, %v19_v2, 0.0  ;;  %v41_v7 = vsel %vm31_vm0, %v21_v5, 0.0  ;;  %v2910_v28 = vld [vmem:[%s3290_s1 + $0x30] sm:$0xff]  ;;  %v2915_v29 = vld [vmem:[%s3290_s1 + $0x20] sm:$0xff]  ;;  %v113_v49 = vlaneseq }
   0x4   :  { %2513 = vmatprep.subr.mxu1 %v2910_v28  ;;  %v2922_v30 = vld [vmem:[%s3290_s1 + $0x10] sm:$0xff]  ;;  %v2931_v31 = vld [vmem:[%s3290_s1] sm:$0xff]  ;;  %vm236_vm9 = vcmask 64512   ;;  %s2829_s7 = smov 96   ;;  %vm409_vm10 = vcmask 130048   ;;  %s2830_s8 = smov 64  }
   0x5   :  { %2514 = vmatpush3.msra.mxu1 %v2910_v28  ;;  %v2935_v63 = vshrl.u32 %v113_v49, 7  ;;  %v30_v3 = vld [vmem:[%s3292_s3] sm:$0xff]  ;;  %s2831_s9 = smov 88   ;;  %s2832_s10 = smov 120   ;;  %vm1884_vm11 = vcmask 195584  }
   0x6   :  { %2515 = vmatprep.subr.mxu1 %v2915_v29  ;;  %s2833_s11 = smov 56   ;;  %s2834_s12 = smov 80  }
   0x7   :  { %36 = vadd.xlane.f32.xlu0 %v35_v6  ;;  %42 = vadd.xlane.f32.xlu1 %v41_v7  ;;  %v123_v4 = vsub.s32 5, %v2935_v63  ;;  %s2835_s13 = smov 112   ;;  %s2836_s14 = smov 48  }
   0x8   :  { %2516 = vmatpush3.msra.mxu1 %v2915_v29  ;;  %s2837_s15 = smov 72   ;;  %s2838_s16 = smov 104  }
   0x9   :  { %2517 = vmatprep.subr.mxu1 %v2922_v30  ;;  %s2839_s17 = smov 40   ;;  %s2840_s18 = smov 32  }
   0xa   :  { %2518 = vmatpush3.msra.mxu1 %v2922_v30  ;;  %s2841_s19 = smov 8   ;;  %s2842_s20 = smov 16  }
   0xb   :  { %2519 = vmatprep.subr.mxu1 %v2931_v31  ;;  %s2843_s21 = smov 24  }
   0xc   :  { %2520 = vmatpush3.msra.mxu1 %v2931_v31 }
  0x8c   :  { %v34_v8 = vpop.xlane.xlu0 %33  ;;  %v40_v9 = vpop.xlane.xlu1 %39 }
  0x8d   :  { %v45_v10 = vmul.f32 0.03125, %v34_v8  ;;  %v47_v11 = vmul.f32 0.03125, %v40_v9  ;;  %v124_v8 = vrot.slane %v30_v3, %v123_v4 }
  0x8f   :  { %v2887_v12 = vsub.f32 %v18_v0, %v45_v10  ;;  %v2889_v13 = vsub.f32 %v20_v1, %v47_v11 }
  0x90   :  { %v37_v14 = vpop.xlane.xlu0 %36  ;;  %v43_v15 = vpop.xlane.xlu1 %42 }
  0x91   :  { %v46_v16 = vmul.f32 0.03125, %v37_v14  ;;  %v48_v17 = vmul.f32 0.03125, %v43_v15  ;;  %v53_v18 = vmul.f32 %v2887_v12, %v2887_v12  ;;  %v55_v19 = vmul.f32 %v2889_v13, %v2889_v13 }
  0x93   :  { %v2895_v20 = vsub.f32 %v19_v2, %v46_v16  ;;  %v2897_v21 = vsub.f32 %v21_v5, %v48_v17  ;;  %v57_v22 = vsel %vm31_vm0, %v53_v18, 0.0  ;;  %v63_v23 = vsel %vm31_vm0, %v55_v19, 0.0 }
  0x94   :  { %58 = vadd.xlane.f32.xlu0 %v57_v22  ;;  %v115_v2 = vsub.s32 4, %v2935_v63 }
  0x95   :  { %v54_v24 = vmul.f32 %v2895_v20, %v2895_v20  ;;  %v56_v25 = vmul.f32 %v2897_v21, %v2897_v21 }
  0x96   :  { %v116_v5 = vrot.slane %v30_v3, %v115_v2 }
  0x97   :  { %v60_v26 = vsel %vm31_vm0, %v54_v24, 0.0  ;;  %v66_v27 = vsel %vm31_vm0, %v56_v25, 0.0 }
  0x98   :  { %64 = vadd.xlane.f32.xlu0 %v63_v23  ;;  %61 = vadd.xlane.f32.xlu1 %v60_v26 }
  0x9c   :  { %67 = vadd.xlane.f32.xlu1 %v66_v27 }
 0x11d   :  { %v59_v32 = vpop.xlane.xlu0 %58 }
 0x11e   :  { %v69_v33 = vmul.f32 0.032258064, %v59_v32 }
 0x120   :  { %2706 = vrsqrt.f32 %v69_v33  ;;  %vm75_vm1 = vcmp.eq.f32.partialorder %v69_v33, inf  ;;  %v78_v42 = vand.u32 2147483648, %v69_v33  ;;  %vm77_vm2 = vcmp.eq.f32.partialorder %v69_v33, 0.0 }
 0x121   :  { %v62_v34 = vpop.xlane.xlu1 %61  ;;  %v65_v35 = vpop.xlane.xlu0 %64 }
 0x122   :  { %v70_v36 = vmul.f32 0.032258064, %v62_v34  ;;  %v71_v37 = vmul.f32 0.032258064, %v65_v35 }
 0x124   :  { %2708 = vrsqrt.f32 %v70_v36  ;;  %vm82_vm3 = vcmp.eq.f32.partialorder %v70_v36, inf  ;;  %vm84_vm4 = vcmp.eq.f32.partialorder %v70_v36, 0.0  ;;  %v85_v50 = vand.u32 2147483648, %v70_v36 }
 0x125   :  { %2710 = vrsqrt.f32 %v71_v37  ;;  %v68_v38 = vpop.xlane.xlu1 %67  ;;  %vm89_vm5 = vcmp.eq.f32.partialorder %v71_v37, inf  ;;  %v92_v53 = vand.u32 2147483648, %v71_v37  ;;  %vm91_vm6 = vcmp.eq.f32.partialorder %v71_v37, 0.0 }
 0x126   :  { %v72_v39 = vmul.f32 0.032258064, %v68_v38 }
 0x128   :  { %2712 = vrsqrt.f32 %v72_v39  ;;  %vm96_vm7 = vcmp.eq.f32.partialorder %v72_v39, inf  ;;  %v99_v61 = vand.u32 2147483648, %v72_v39  ;;  %vm98_vm8 = vcmp.eq.f32.partialorder %v72_v39, 0.0 }
 0x12d   :  { %v2707_v40 = vpop.eup %2706 }
 0x12e   :  { %v74_v41 = vmul.f32 %v2707_v40, %v69_v33 }
 0x130   :  { %v76_v43 = vsel %vm75_vm1, %v69_v33, %v74_v41 }
 0x131   :  { %v2709_v44 = vpop.eup %2708  ;;  %v79_v45 = vsel %vm77_vm2, %v78_v42, %v76_v43 }
 0x132   :  { %v2711_v46 = vpop.eup %2710  ;;  %v81_v47 = vmul.f32 %v2709_v44, %v70_v36  ;;  %v101_v48 = vadd.f32 1e-06, %v79_v45 }
 0x133   :  { %v88_v51 = vmul.f32 %v2711_v46, %v71_v37 }
 0x134   :  { %v83_v52 = vsel %vm82_vm3, %v70_v36, %v81_v47  ;;  %2714 = vrcp.f32 %v101_v48 }
 0x135   :  { %v2713_v54 = vpop.eup %2712  ;;  %v86_v55 = vsel %vm84_vm4, %v85_v50, %v83_v52  ;;  %v90_v56 = vsel %vm89_vm5, %v71_v37, %v88_v51  ;;  %vm2227_vm5 = vcmask 523264  }
 0x136   :  { %v102_v57 = vadd.f32 1e-06, %v86_v55  ;;  %v93_v58 = vsel %vm91_vm6, %v92_v53, %v90_v56  ;;  %v95_v59 = vmul.f32 %v2713_v54, %v72_v39 }
 0x137   :  { %v103_v60 = vadd.f32 1e-06, %v93_v58 }
 0x138   :  { %2716 = vrcp.f32 %v102_v57  ;;  %v97_v62 = vsel %vm96_vm7, %v72_v39, %v95_v59 }
 0x139   :  { %2718 = vrcp.f32 %v103_v60  ;;  %v100_v0 = vsel %vm98_vm8, %v99_v61, %v97_v62 }
 0x13a   :  { %v104_v1 = vadd.f32 1e-06, %v100_v0 }
 0x13c   :  { %2720 = vrcp.f32 %v104_v1 }
 0x141   :  { %v2715_v6 = vpop.eup %2714 }
 0x142   :  { %v106_v7 = vmul.f32 %v2715_v6, %v2887_v12 }
 0x144   :  { %v117_v9 = vmul.f32 %v116_v5, %v106_v7 }
 0x145   :  { %v2717_v10 = vpop.eup %2716 }
 0x146   :  { %v2719_v11 = vpop.eup %2718  ;;  %v125_v14 = vadd.f32 %v124_v8, %v117_v9  ;;  %v108_v15 = vmul.f32 %v2717_v10, %v2895_v20  ;;  %v131_v20 = vsub.s32 0, %v2935_v63 }
 0x147   :  { %v110_v16 = vmul.f32 %v2719_v11, %v2889_v13 }
 0x148   :  { %2521 = vmatprep.mubr.msk.f32.mxu1 %vm31_vm0, %v125_v14  ;;  %v118_v17 = vmul.f32 %v116_v5, %v108_v15  ;;  %v132_v13 = vrot.slane %v30_v3, %v131_v20 }
 0x149   :  { %v2721_v18 = vpop.eup %2720  ;;  %v119_v19 = vmul.f32 %v116_v5, %v110_v16 }
 0x14a   :  { %v126_v22 = vadd.f32 %v124_v8, %v118_v17  ;;  %v112_v23 = vmul.f32 %v2721_v18, %v2897_v21 }
 0x14b   :  { %v127_v24 = vadd.f32 %v124_v8, %v119_v19 }
 0x14c   :  { %2522 = vmatmul.mubr.msk.f32.vlgmr.msra.gmra.mxu1 %vm31_vm0, %v126_v22  ;;  %v120_v12 = vmul.f32 %v116_v5, %v112_v23 }
 0x14d   :  { %2524 = vmatprep.mubr.msk.f32.mxu1 %vm31_vm0, %v127_v24 }
 0x14e   :  { %v128_v25 = vadd.f32 %v124_v8, %v120_v12 }
 0x150   :  { %2525 = vmatmul.mubr.msk.f32.gmra.mxu1 %vm31_vm0, %v128_v25 }
 0x20c   :  { %v2523_v26 = vpop.f32.mrf.mxu1 }
 0x20d   :  { %v2951_v27 = vadd.f32 %v2523_v26, %v132_v13 }
 0x20e   :  { %v211_v32 = vpop.f32.mrf.mxu1 }
 0x20f   :  { %v2953_v33 = vadd.f32 %v211_v32, %v132_v13  ;;  %234 = vrot.lane.b32.xlu0 %v2951_v27, %s2829_s7 }
 0x210   :  { %v2526_v21 = vpop.f32.mrf.mxu1 }
 0x211   :  { %232 = vrot.lane.b32.xlu1 %v2953_v33, %s2829_s7  ;;  %2531 = vmatprep.mubr.msk.f32.mxu1 %vm236_vm9, %v2953_v33  ;;  %v2959_v35 = vadd.f32 %v2526_v21, %v132_v13 }
 0x212   :  { %v221_v34 = vpop.f32.mrf.mxu1 }
 0x213   :  { %v2961_v36 = vadd.f32 %v221_v34, %v132_v13 }
 0x215   :  { %324 = vrot.lane.b32.xlu1 %v2959_v35, %s2829_s7  ;;  %2538 = vmatprep.mubr.msk.f32.mxu0 %vm236_vm9, %v2961_v36 }
 0x219   :  { %322 = vrot.lane.b32.xlu1 %v2961_v36, %s2829_s7 }
 0x281   :  { %v235_v37 = vpop.permute.xlu0 %234 }
 0x282   :  { %2527 = vmatprep.subr.msk.mxu1 %vm236_vm9, %v235_v37 }
 0x283   :  { %v233_v38 = vpop.permute.xlu1 %232  ;;  %2528 = vmatpush3.xpose.msk.msra.mxu1 %vm236_vm9, %v235_v37 }
 0x284   :  { %2529 = vmatprep.subr.msk.mxu1 %vm236_vm9, %v233_v38 }
 0x287   :  { %v325_v39 = vpop.permute.xlu1 %324  ;;  %2530 = vmatpush3.xpose.msk.msra.mxu1 %vm236_vm9, %v233_v38 }
 0x288   :  { %2534 = vmatprep.subr.msk.mxu0 %vm236_vm9, %v325_v39 }
 0x289   :  { %2535 = vmatpush3.xpose.msk.msra.mxu0 %vm236_vm9, %v325_v39 }
 0x28a   :  { %2532 = vmatmul.mubr.msk.f32.vlgmr.msra.gmra.mxu1 %vm236_vm9, %v2951_v27 }
 0x28b   :  { %v323_v40 = vpop.permute.xlu1 %322 }
 0x28c   :  { %2536 = vmatprep.subr.msk.mxu0 %vm236_vm9, %v323_v40 }
 0x28d   :  { %2537 = vmatpush3.xpose.msk.msra.mxu0 %vm236_vm9, %v323_v40 }
 0x290   :  { %2539 = vmatmul.mubr.msk.f32.vlgmr.msra.gmra.mxu0 %vm236_vm9, %v2959_v35 }
 0x34a   :  { %v2533_v41 = vpop.f32.mrf.mxu1 }
 0x34b   :  { %v413_v42 = vsel %vm409_vm10, %v2533_v41, -inf }
 0x34c   :  { %414 = vmax.xlane.f32.xlu1 %v413_v42  ;;  %v311_v43 = vpop.f32.mrf.mxu1 }
 0x34d   :  { %v410_v44 = vsel %vm409_vm10, %v311_v43, -inf }
 0x34e   :  { %411 = vmax.xlane.f32.xlu0 %v410_v44 }
 0x350   :  { %v2540_v45 = vpop.f32.mrf.mxu0 }
 0x351   :  { %v419_v48 = vsel %vm409_vm10, %v2540_v45, -inf }
 0x352   :  { %v400_v46 = vpop.f32.mrf.mxu0 }
 0x353   :  { %v416_v47 = vsel %vm409_vm10, %v400_v46, -inf }
 0x354   :  { %417 = vmax.xlane.f32.xlu0 %v416_v47 }
 0x358   :  { %420 = vmax.xlane.f32.xlu0 %v419_v48 }
 0x35d   :  { %454 = vrot.lane.b32.xlu1 %v2953_v33, %s2830_s8 }
 0x361   :  { %543 = vrot.lane.b32.xlu1 %v2959_v35, %s2830_s8 }
 0x365   :  { %634 = vrot.lane.b32.xlu1 %v2951_v27, %s2831_s9 }
 0x369   :  { %632 = vrot.lane.b32.xlu1 %v2953_v33, %s2831_s9 }
 0x36d   :  { %628 = vrot.lane.b32.xlu1 %v2953_v33, %s2832_s10 }
 0x36e   :  { %456 = vrot.lane.b32.xlu0 %v2951_v27, %s2830_s8 }
 0x372   :  { %541 = vrot.lane.b32.xlu0 %v2961_v36, %s2830_s8 }
 0x376   :  { %725 = vrot.lane.b32.xlu0 %v2959_v35, %s2831_s9 }
 0x3d5   :  { %v415_v49 = vpop.xlane.xlu1 %414 }
 0x3d6   :  { %v423_v50 = vsub.f32 %v2533_v41, %v415_v49 }
 0x3d7   :  { %v412_v51 = vpop.xlane.xlu0 %411 }
 0x3d8   :  { %v428_v52 = vmul.f32 1.442695, %v423_v50  ;;  %v422_v53 = vsub.f32 %v311_v43, %v412_v51 }
 0x3d9   :  { %v455_v54 = vpop.permute.xlu1 %454 }
 0x3da   :  { %2722 = vpow2.f32 %v428_v52  ;;  %v426_v55 = vmul.f32 1.442695, %v422_v53 }
 0x3dc   :  { %2724 = vpow2.f32 %v426_v55 }
 0x3dd   :  { %v544_v56 = vpop.permute.xlu1 %543  ;;  %v418_v57 = vpop.xlane.xlu0 %417 }
 0x3de   :  { %v424_v58 = vsub.f32 %v400_v46, %v418_v57 }
 0x3e0   :  { %v430_v59 = vmul.f32 1.442695, %v424_v58 }
 0x3e1   :  { %v635_v60 = vpop.permute.xlu1 %634  ;;  %v421_v61 = vpop.xlane.xlu0 %420 }
 0x3e2   :  { %2726 = vpow2.f32 %v430_v59  ;;  %v425_v62 = vsub.f32 %v2540_v45, %v421_v61  ;;  %2555 = vmatprep.subr.msk.mxu0 %vm236_vm9, %v635_v60 }
 0x3e3   :  { %2556 = vmatpush3.xpose.msk.msra.mxu0 %vm236_vm9, %v635_v60 }
 0x3e4   :  { %v432_v0 = vmul.f32 1.442695, %v425_v62 }
 0x3e5   :  { %v633_v1 = vpop.permute.xlu1 %632  ;;  %v457_v2 = vpop.permute.xlu0 %456 }
 0x3e6   :  { %2728 = vpow2.f32 %v432_v0  ;;  %2541 = vmatprep.subr.mxu1 %v457_v2  ;;  %2557 = vmatprep.subr.msk.mxu0 %vm236_vm9, %v633_v1 }
 0x3e7   :  { %v2723_v3 = vpop.eup %2722  ;;  %2542 = vmatpush3.msra.mxu1 %v457_v2  ;;  %2558 = vmatpush3.xpose.msk.msra.mxu0 %vm236_vm9, %v633_v1 }
 0x3e8   :  { %2543 = vmatprep.subr.mxu1 %v455_v54  ;;  %v437_v4 = vsel %vm409_vm10, %v2723_v3, 0.0 }
 0x3e9   :  { %v2725_v5 = vpop.eup %2724  ;;  %438 = vadd.xlane.f32.xlu1 %v437_v4  ;;  %v629_v6 = vpop.permute.xlu1 %628  ;;  %2544 = vmatpush3.msra.mxu1 %v455_v54 }
 0x3ea   :  { %2548 = vmatprep.subr.mxu1 %v544_v56  ;;  %2559 = vmatprep.mubr.msk.f32.mxu0 %vm236_vm9, %v629_v6  ;;  %v434_v7 = vsel %vm409_vm10, %v2725_v5, 0.0  ;;  %v542_v14 = vpop.permute.xlu0 %541 }
 0x3eb   :  { %435 = vadd.xlane.f32.xlu0 %v434_v7 }
 0x3ee   :  { %v726_v15 = vpop.permute.xlu0 %725 }
 0x3ef   :  { %v2727_v8 = vpop.eup %2726 }
 0x3f0   :  { %v440_v9 = vsel %vm409_vm10, %v2727_v8, 0.0 }
 0x3f1   :  { %441 = vadd.xlane.f32.xlu0 %v440_v9 }
 0x3f3   :  { %v2729_v10 = vpop.eup %2728 }
 0x3f4   :  { %v443_v11 = vsel %vm409_vm10, %v2729_v10, 0.0 }
 0x3f5   :  { %444 = vadd.xlane.f32.xlu1 %v443_v11 }
 0x406   :  { %723 = vrot.lane.b32.xlu1 %v2961_v36, %s2831_s9 }
 0x407   :  { %630 = vrot.lane.b32.xlu0 %v2951_v27, %s2832_s10 }
 0x40a   :  { %721 = vrot.lane.b32.xlu1 %v2959_v35, %s2832_s10 }
 0x40b   :  { %719 = vrot.lane.b32.xlu0 %v2961_v36, %s2832_s10 }
 0x472   :  { %v439_v16 = vpop.xlane.xlu1 %438 }
 0x473   :  { %2730 = vrcp.f32 %v439_v16 }
 0x474   :  { %v436_v17 = vpop.xlane.xlu0 %435 }
 0x475   :  { %2732 = vrcp.f32 %v436_v17 }
 0x47a   :  { %v442_v18 = vpop.xlane.xlu0 %441 }
 0x47b   :  { %2734 = vrcp.f32 %v442_v18 }
 0x47e   :  { %v445_v19 = vpop.xlane.xlu1 %444  ;;  %v631_v22 = vpop.permute.xlu0 %630 }
 0x47f   :  { %2736 = vrcp.f32 %v445_v19  ;;  %2560 = vmatmul.mubr.msk.f32.vlgmr.msra.gmra.mxu0 %vm236_vm9, %v631_v22 }
 0x480   :  { %v2731_v23 = vpop.eup %2730 }
 0x481   :  { %v451_v25 = vmul.f32 %v2731_v23, %v2723_v3 }
 0x482   :  { %v2733_v24 = vpop.eup %2732  ;;  %v720_v21 = vpop.permute.xlu0 %719 }
 0x483   :  { %v450_v12 = vmul.f32 %v2733_v24, %v2725_v5  ;;  %v724_v34 = vpop.permute.xlu1 %723 }
 0x485   :  { %2545 = vmatprep.mubr.msk.f32.mxu1 %vm409_vm10, %v450_v12 }
 0x486   :  { %2546 = vmatmul.mubr.msk.f32.vlgmr.msra.gmra.mxu1 %vm409_vm10, %v451_v25 }
 0x487   :  { %2549 = vmatpush3.msra.mxu1 %v544_v56  ;;  %v722_v37 = vpop.permute.xlu1 %721 }
 0x488   :  { %v2735_v20 = vpop.eup %2734  ;;  %2550 = vmatprep.subr.mxu1 %v542_v14 }
 0x489   :  { %2551 = vmatpush3.msra.mxu1 %v542_v14  ;;  %v452_v13 = vmul.f32 %v2735_v20, %v2727_v8 }
 0x48a   :  { %2562 = vmatprep.subr.msk.mxu1 %vm236_vm9, %v726_v15 }
 0x48b   :  { %2552 = vmatprep.mubr.msk.f32.mxu1 %vm409_vm10, %v452_v13 }
 0x48c   :  { %v2737_v26 = vpop.eup %2736 }
 0x48d   :  { %v453_v32 = vmul.f32 %v2737_v26, %v2729_v10 }
 0x48f   :  { %2553 = vmatmul.mubr.msk.f32.vlgmr.msra.gmra.mxu1 %vm409_vm10, %v453_v32 }
 0x490   :  { %2563 = vmatpush3.xpose.msk.msra.mxu1 %vm236_vm9, %v726_v15  ;;  %2566 = vmatprep.mubr.msk.f32.mxu1 %vm236_vm9, %v720_v21 }
 0x491   :  { %2564 = vmatprep.subr.msk.mxu1 %vm236_vm9, %v724_v34 }
 0x494   :  { %2565 = vmatpush3.xpose.msk.msra.mxu1 %vm236_vm9, %v724_v34 }
 0x497   :  { %2567 = vmatmul.mubr.msk.f32.vlgmr.msra.gmra.mxu1 %vm236_vm9, %v722_v37 }
 0x53f   :  { %v2561_v38 = vpop.f32.mrf.mxu0 }
 0x540   :  { %v813_v39 = vsel %vm409_vm10, %v2561_v38, -inf }
 0x541   :  { %814 = vmax.xlane.f32.xlu1 %v813_v39  ;;  %v710_v40 = vpop.f32.mrf.mxu0 }
 0x542   :  { %v810_v41 = vsel %vm409_vm10, %v710_v40, -inf }
 0x543   :  { %811 = vmax.xlane.f32.xlu0 %v810_v41 }
 0x546   :  { %v3025_v42 = vpop.f32.mrf.mxu1 }
 0x548   :  { %v3027_v43 = vpop.f32.mrf.mxu1 }
 0x54f   :  { %v3029_v44 = vpop.f32.mrf.mxu1 }
 0x551   :  { %v3031_v45 = vpop.f32.mrf.mxu1 }
 0x557   :  { %v2568_v46 = vpop.f32.mrf.mxu1 }
 0x558   :  { %v819_v49 = vsel %vm409_vm10, %v2568_v46, -inf }
 0x559   :  { %v801_v47 = vpop.f32.mrf.mxu1 }
 0x55a   :  { %v816_v48 = vsel %vm409_vm10, %v801_v47, -inf }
 0x55b   :  { %817 = vmax.xlane.f32.xlu0 %v816_v48 }
 0x55f   :  { %820 = vmax.xlane.f32.xlu0 %v819_v49 }
 0x5ca   :  { %v815_v50 = vpop.xlane.xlu1 %814 }
 0x5cb   :  { %v823_v51 = vsub.f32 %v2561_v38, %v815_v50 }
 0x5cc   :  { %v812_v52 = vpop.xlane.xlu0 %811 }
 0x5cd   :  { %v828_v53 = vmul.f32 1.442695, %v823_v51  ;;  %v822_v54 = vsub.f32 %v710_v40, %v812_v52 }
 0x5cf   :  { %2738 = vpow2.f32 %v828_v53  ;;  %v826_v55 = vmul.f32 1.442695, %v822_v54 }
 0x5d1   :  { %2740 = vpow2.f32 %v826_v55 }
 0x5dc   :  { %v2739_v56 = vpop.eup %2738 }
 0x5dd   :  { %v837_v57 = vsel %vm409_vm10, %v2739_v56, 0.0 }
 0x5de   :  { %v2741_v58 = vpop.eup %2740  ;;  %838 = vadd.xlane.f32.xlu1 %v837_v57 }
 0x5df   :  { %v834_v59 = vsel %vm409_vm10, %v2741_v58, 0.0 }
 0x5e0   :  { %835 = vadd.xlane.f32.xlu0 %v834_v59 }
 0x5e4   :  { %v818_v60 = vpop.xlane.xlu0 %817 }
 0x5e5   :  { %v824_v61 = vsub.f32 %v801_v47, %v818_v60 }
 0x5e7   :  { %v830_v0 = vmul.f32 1.442695, %v824_v61 }
 0x5e8   :  { %v821_v62 = vpop.xlane.xlu0 %820 }
 0x5e9   :  { %v825_v1 = vsub.f32 %v2568_v46, %v821_v62  ;;  %2742 = vpow2.f32 %v830_v0 }
 0x5eb   :  { %v832_v2 = vmul.f32 1.442695, %v825_v1 }
 0x5ed   :  { %2744 = vpow2.f32 %v832_v2 }
 0x5ef   :  { %854 = vrot.lane.b32.xlu1 %v2953_v33, %s2833_s11 }
 0x5f3   :  { %943 = vrot.lane.b32.xlu1 %v2959_v35, %s2833_s11 }
 0x5f6   :  { %856 = vrot.lane.b32.xlu0 %v2951_v27, %s2833_s11  ;;  %v2743_v3 = vpop.eup %2742 }
 0x5f7   :  { %1034 = vrot.lane.b32.xlu1 %v2951_v27, %s2834_s12  ;;  %v840_v4 = vsel %vm409_vm10, %v2743_v3, 0.0 }
 0x5fa   :  { %941 = vrot.lane.b32.xlu0 %v2961_v36, %s2833_s11  ;;  %v2745_v5 = vpop.eup %2744 }
 0x5fb   :  { %1032 = vrot.lane.b32.xlu1 %v2953_v33, %s2834_s12  ;;  %v843_v6 = vsel %vm409_vm10, %v2745_v5, 0.0 }
 0x5fe   :  { %1125 = vrot.lane.b32.xlu0 %v2959_v35, %s2834_s12 }
 0x5ff   :  { %1028 = vrot.lane.b32.xlu1 %v2953_v33, %s2835_s13 }
 0x61d   :  { %841 = vadd.xlane.f32.xlu0 %v840_v4 }
 0x623   :  { %844 = vadd.xlane.f32.xlu1 %v843_v6 }
 0x633   :  { %1030 = vrot.lane.b32.xlu0 %v2951_v27, %s2835_s13 }
 0x634   :  { %1123 = vrot.lane.b32.xlu1 %v2961_v36, %s2834_s12 }
 0x637   :  { %1119 = vrot.lane.b32.xlu0 %v2961_v36, %s2835_s13 }
 0x638   :  { %1121 = vrot.lane.b32.xlu1 %v2959_v35, %s2835_s13 }
 0x667   :  { %v839_v7 = vpop.xlane.xlu1 %838 }
 0x668   :  { %2746 = vrcp.f32 %v839_v7 }
 0x669   :  { %v836_v8 = vpop.xlane.xlu0 %835 }
 0x66a   :  { %2748 = vrcp.f32 %v836_v8 }
 0x66b   :  { %v855_v9 = vpop.permute.xlu1 %854 }
 0x66d   :  { %v857_v10 = vpop.permute.xlu0 %856 }
 0x66e   :  { %2569 = vmatprep.subr.mxu0 %v857_v10 }
 0x66f   :  { %v944_v11 = vpop.permute.xlu1 %943  ;;  %2570 = vmatpush3.msra.mxu0 %v857_v10 }
 0x670   :  { %2571 = vmatprep.subr.mxu0 %v855_v9  ;;  %2576 = vmatprep.subr.mxu1 %v944_v11 }
 0x671   :  { %2572 = vmatpush3.msra.mxu0 %v855_v9  ;;  %2577 = vmatpush3.msra.mxu1 %v944_v11  ;;  %v942_v14 = vpop.permute.xlu0 %941 }
 0x672   :  { %2578 = vmatprep.subr.mxu1 %v942_v14 }
 0x673   :  { %v1035_v15 = vpop.permute.xlu1 %1034  ;;  %2579 = vmatpush3.msra.mxu1 %v942_v14 }
 0x674   :  { %2583 = vmatprep.subr.msk.mxu0 %vm236_vm9, %v1035_v15 }
 0x675   :  { %v1126_v16 = vpop.permute.xlu0 %1125  ;;  %v2747_v17 = vpop.eup %2746 }
 0x676   :  { %2590 = vmatprep.subr.msk.mxu1 %vm236_vm9, %v1126_v16  ;;  %v851_v23 = vmul.f32 %v2747_v17, %v2739_v56 }
 0x677   :  { %v2749_v18 = vpop.eup %2748  ;;  %v1033_v19 = vpop.permute.xlu1 %1032 }
 0x678   :  { %v850_v22 = vmul.f32 %v2749_v18, %v2741_v58 }
 0x67a   :  { %2573 = vmatprep.mubr.msk.f32.mxu0 %vm409_vm10, %v850_v22 }
 0x67b   :  { %v1029_v24 = vpop.permute.xlu1 %1028  ;;  %2574 = vmatmul.mubr.msk.f32.vlgmr.msra.gmra.mxu0 %vm409_vm10, %v851_v23 }
 0x67c   :  { %2584 = vmatpush3.xpose.msk.msra.mxu0 %vm236_vm9, %v1035_v15  ;;  %2587 = vmatprep.mubr.msk.f32.mxu0 %vm236_vm9, %v1029_v24 }
 0x67d   :  { %2585 = vmatprep.subr.msk.mxu0 %vm236_vm9, %v1033_v19 }
 0x680   :  { %2586 = vmatpush3.xpose.msk.msra.mxu0 %vm236_vm9, %v1033_v19 }
 0x6a6   :  { %v842_v12 = vpop.xlane.xlu0 %841 }
 0x6a7   :  { %2750 = vrcp.f32 %v842_v12 }
 0x6aa   :  { %v1031_v25 = vpop.permute.xlu0 %1030 }
 0x6ab   :  { %2588 = vmatmul.mubr.msk.f32.vlgmr.msra.gmra.mxu0 %vm236_vm9, %v1031_v25 }
 0x6ac   :  { %v845_v20 = vpop.xlane.xlu1 %844 }
 0x6ad   :  { %2752 = vrcp.f32 %v845_v20 }
 0x6ae   :  { %v1120_v34 = vpop.permute.xlu0 %1119 }
 0x6b0   :  { %v1124_v37 = vpop.permute.xlu1 %1123 }
 0x6b4   :  { %v2751_v13 = vpop.eup %2750  ;;  %v1122_v38 = vpop.permute.xlu1 %1121 }
 0x6b5   :  { %v852_v26 = vmul.f32 %v2751_v13, %v2743_v3 }
 0x6b7   :  { %2580 = vmatprep.mubr.msk.f32.mxu1 %vm409_vm10, %v852_v26 }
 0x6ba   :  { %v2753_v32 = vpop.eup %2752 }
 0x6bb   :  { %v853_v21 = vmul.f32 %v2753_v32, %v2745_v5 }
 0x6bd   :  { %2581 = vmatmul.mubr.msk.f32.vlgmr.msra.gmra.mxu1 %vm409_vm10, %v853_v21 }
 0x6be   :  { %2591 = vmatpush3.xpose.msk.msra.mxu1 %vm236_vm9, %v1126_v16  ;;  %2594 = vmatprep.mubr.msk.f32.mxu1 %vm236_vm9, %v1120_v34 }
 0x6bf   :  { %2592 = vmatprep.subr.msk.mxu1 %vm236_vm9, %v1124_v37 }
 0x6c2   :  { %2593 = vmatpush3.xpose.msk.msra.mxu1 %vm236_vm9, %v1124_v37 }
 0x6c5   :  { %2595 = vmatmul.mubr.msk.f32.vlgmr.msra.gmra.mxu1 %vm236_vm9, %v1122_v38 }
 0x73b   :  { %v3067_v39 = vpop.f32.mrf.mxu0 }
 0x73d   :  { %v3069_v40 = vpop.f32.mrf.mxu0 }
 0x76b   :  { %v2589_v41 = vpop.f32.mrf.mxu0 }
 0x76c   :  { %v1213_v46 = vsel %vm409_vm10, %v2589_v41, -inf }
 0x76d   :  { %1214 = vmax.xlane.f32.xlu1 %v1213_v46  ;;  %v1110_v47 = vpop.f32.mrf.mxu0 }
 0x76e   :  { %v1210_v48 = vsel %vm409_vm10, %v1110_v47, -inf }
 0x76f   :  { %1211 = vmax.xlane.f32.xlu0 %v1210_v48 }
 0x77d   :  { %v3073_v49 = vpop.f32.mrf.mxu1 }
 0x77f   :  { %v3075_v50 = vpop.f32.mrf.mxu1 }
 0x785   :  { %v2596_v51 = vpop.f32.mrf.mxu1 }
 0x786   :  { %v1219_v54 = vsel %vm409_vm10, %v2596_v51, -inf }
 0x787   :  { %v1201_v52 = vpop.f32.mrf.mxu1 }
 0x788   :  { %v1216_v53 = vsel %vm409_vm10, %v1201_v52, -inf }
 0x789   :  { %1217 = vmax.xlane.f32.xlu0 %v1216_v53 }
 0x78d   :  { %1220 = vmax.xlane.f32.xlu0 %v1219_v54 }
 0x7f6   :  { %v1215_v55 = vpop.xlane.xlu1 %1214 }
 0x7f7   :  { %v1223_v56 = vsub.f32 %v2589_v41, %v1215_v55 }
 0x7f8   :  { %v1212_v57 = vpop.xlane.xlu0 %1211 }
 0x7f9   :  { %v1228_v58 = vmul.f32 1.442695, %v1223_v56  ;;  %v1222_v59 = vsub.f32 %v1110_v47, %v1212_v57 }
 0x7fb   :  { %2754 = vpow2.f32 %v1228_v58  ;;  %v1226_v60 = vmul.f32 1.442695, %v1222_v59 }
 0x7fd   :  { %2756 = vpow2.f32 %v1226_v60 }
 0x808   :  { %v2755_v61 = vpop.eup %2754 }
 0x809   :  { %v1237_v62 = vsel %vm409_vm10, %v2755_v61, 0.0 }
 0x80a   :  { %v2757_v0 = vpop.eup %2756  ;;  %1238 = vadd.xlane.f32.xlu1 %v1237_v62 }
 0x80b   :  { %v1234_v1 = vsel %vm409_vm10, %v2757_v0, 0.0 }
 0x80c   :  { %1235 = vadd.xlane.f32.xlu0 %v1234_v1 }
 0x812   :  { %v1218_v2 = vpop.xlane.xlu0 %1217 }
 0x813   :  { %v1224_v3 = vsub.f32 %v1201_v52, %v1218_v2 }
 0x815   :  { %v1230_v5 = vmul.f32 1.442695, %v1224_v3 }
 0x816   :  { %v1221_v4 = vpop.xlane.xlu0 %1220 }
 0x817   :  { %v1225_v6 = vsub.f32 %v2596_v51, %v1221_v4  ;;  %2758 = vpow2.f32 %v1230_v5 }
 0x819   :  { %v1232_v7 = vmul.f32 1.442695, %v1225_v6 }
 0x81b   :  { %1254 = vrot.lane.b32.xlu1 %v2953_v33, %s2836_s14  ;;  %2760 = vpow2.f32 %v1232_v7 }
 0x81f   :  { %1343 = vrot.lane.b32.xlu1 %v2959_v35, %s2836_s14 }
 0x822   :  { %1256 = vrot.lane.b32.xlu0 %v2951_v27, %s2836_s14 }
 0x823   :  { %1434 = vrot.lane.b32.xlu1 %v2951_v27, %s2837_s15 }
 0x824   :  { %v2759_v8 = vpop.eup %2758 }
 0x825   :  { %v1240_v9 = vsel %vm409_vm10, %v2759_v8, 0.0 }
 0x826   :  { %1341 = vrot.lane.b32.xlu0 %v2961_v36, %s2836_s14 }
 0x827   :  { %1432 = vrot.lane.b32.xlu1 %v2953_v33, %s2837_s15 }
 0x828   :  { %v2761_v10 = vpop.eup %2760 }
 0x829   :  { %v1243_v11 = vsel %vm409_vm10, %v2761_v10, 0.0 }
 0x82a   :  { %1525 = vrot.lane.b32.xlu0 %v2959_v35, %s2837_s15 }
 0x82b   :  { %1428 = vrot.lane.b32.xlu1 %v2953_v33, %s2838_s16 }
 0x849   :  { %1241 = vadd.xlane.f32.xlu0 %v1240_v9 }
 0x84f   :  { %1244 = vadd.xlane.f32.xlu1 %v1243_v11 }
 0x85f   :  { %1430 = vrot.lane.b32.xlu0 %v2951_v27, %s2838_s16 }
 0x860   :  { %1523 = vrot.lane.b32.xlu1 %v2961_v36, %s2837_s15 }
 0x863   :  { %1519 = vrot.lane.b32.xlu0 %v2961_v36, %s2838_s16 }
 0x864   :  { %1521 = vrot.lane.b32.xlu1 %v2959_v35, %s2838_s16 }
 0x893   :  { %v1239_v14 = vpop.xlane.xlu1 %1238 }
 0x894   :  { %2762 = vrcp.f32 %v1239_v14 }
 0x895   :  { %v1236_v15 = vpop.xlane.xlu0 %1235 }
 0x896   :  { %2764 = vrcp.f32 %v1236_v15 }
 0x897   :  { %v1255_v16 = vpop.permute.xlu1 %1254 }
 0x899   :  { %v1257_v17 = vpop.permute.xlu0 %1256 }
 0x89a   :  { %2597 = vmatprep.subr.mxu0 %v1257_v17 }
 0x89b   :  { %v1344_v18 = vpop.permute.xlu1 %1343  ;;  %2598 = vmatpush3.msra.mxu0 %v1257_v17 }
 0x89c   :  { %2599 = vmatprep.subr.mxu0 %v1255_v16  ;;  %2604 = vmatprep.subr.mxu1 %v1344_v18 }
 0x89d   :  { %2600 = vmatpush3.msra.mxu0 %v1255_v16  ;;  %2605 = vmatpush3.msra.mxu1 %v1344_v18  ;;  %v1342_v19 = vpop.permute.xlu0 %1341 }
 0x89e   :  { %2606 = vmatprep.subr.mxu1 %v1342_v19 }
 0x89f   :  { %v1435_v22 = vpop.permute.xlu1 %1434  ;;  %2607 = vmatpush3.msra.mxu1 %v1342_v19 }
 0x8a0   :  { %2611 = vmatprep.subr.msk.mxu0 %vm236_vm9, %v1435_v22 }
 0x8a1   :  { %v1526_v23 = vpop.permute.xlu0 %1525  ;;  %v2763_v24 = vpop.eup %2762 }
 0x8a2   :  { %2618 = vmatprep.subr.msk.mxu1 %vm236_vm9, %v1526_v23  ;;  %v1251_v13 = vmul.f32 %v2763_v24, %v2755_v61 }
 0x8a3   :  { %v2765_v12 = vpop.eup %2764  ;;  %v1433_v25 = vpop.permute.xlu1 %1432 }
 0x8a4   :  { %v1250_v20 = vmul.f32 %v2765_v12, %v2757_v0 }
 0x8a6   :  { %2601 = vmatprep.mubr.msk.f32.mxu0 %vm409_vm10, %v1250_v20 }
 0x8a7   :  { %v1429_v26 = vpop.permute.xlu1 %1428  ;;  %2602 = vmatmul.mubr.msk.f32.vlgmr.msra.gmra.mxu0 %vm409_vm10, %v1251_v13 }
 0x8a8   :  { %2612 = vmatpush3.xpose.msk.msra.mxu0 %vm236_vm9, %v1435_v22  ;;  %2615 = vmatprep.mubr.msk.f32.mxu0 %vm236_vm9, %v1429_v26 }
 0x8a9   :  { %2613 = vmatprep.subr.msk.mxu0 %vm236_vm9, %v1433_v25 }
 0x8ac   :  { %2614 = vmatpush3.xpose.msk.msra.mxu0 %vm236_vm9, %v1433_v25 }
 0x8d2   :  { %v1242_v32 = vpop.xlane.xlu0 %1241 }
 0x8d3   :  { %2766 = vrcp.f32 %v1242_v32 }
 0x8d6   :  { %v1431_v21 = vpop.permute.xlu0 %1430 }
 0x8d7   :  { %2616 = vmatmul.mubr.msk.f32.vlgmr.msra.gmra.mxu0 %vm236_vm9, %v1431_v21 }
 0x8d8   :  { %v1245_v34 = vpop.xlane.xlu1 %1244 }
 0x8d9   :  { %2768 = vrcp.f32 %v1245_v34 }
 0x8da   :  { %v1520_v47 = vpop.permute.xlu0 %1519 }
 0x8dc   :  { %v1524_v48 = vpop.permute.xlu1 %1523 }
 0x8e0   :  { %v2767_v37 = vpop.eup %2766  ;;  %v1522_v51 = vpop.permute.xlu1 %1521 }
 0x8e1   :  { %v1252_v38 = vmul.f32 %v2767_v37, %v2759_v8 }
 0x8e3   :  { %2608 = vmatprep.mubr.msk.f32.mxu1 %vm409_vm10, %v1252_v38 }
 0x8e6   :  { %v2769_v41 = vpop.eup %2768 }
 0x8e7   :  { %v1253_v46 = vmul.f32 %v2769_v41, %v2761_v10 }
 0x8e9   :  { %2609 = vmatmul.mubr.msk.f32.vlgmr.msra.gmra.mxu1 %vm409_vm10, %v1253_v46 }
 0x8ea   :  { %2619 = vmatpush3.xpose.msk.msra.mxu1 %vm236_vm9, %v1526_v23  ;;  %2622 = vmatprep.mubr.msk.f32.mxu1 %vm236_vm9, %v1520_v47 }
 0x8eb   :  { %2620 = vmatprep.subr.msk.mxu1 %vm236_vm9, %v1524_v48 }
 0x8ee   :  { %2621 = vmatpush3.xpose.msk.msra.mxu1 %vm236_vm9, %v1524_v48 }
 0x8f1   :  { %2623 = vmatmul.mubr.msk.f32.vlgmr.msra.gmra.mxu1 %vm236_vm9, %v1522_v51 }
 0x967   :  { %v2603_v52 = vpop.f32.mrf.mxu0 }
 0x969   :  { %v1332_v53 = vpop.f32.mrf.mxu0 }
 0x997   :  { %v2617_v54 = vpop.f32.mrf.mxu0 }
 0x998   :  { %v1613_v55 = vsel %vm409_vm10, %v2617_v54, -inf }
 0x999   :  { %1614 = vmax.xlane.f32.xlu1 %v1613_v55  ;;  %v1510_v56 = vpop.f32.mrf.mxu0 }
 0x99a   :  { %v1610_v57 = vsel %vm409_vm10, %v1510_v56, -inf }
 0x99b   :  { %1611 = vmax.xlane.f32.xlu0 %v1610_v57 }
 0x9a9   :  { %v3113_v58 = vpop.f32.mrf.mxu1 }
 0x9ab   :  { %v1419_v59 = vpop.f32.mrf.mxu1 }
 0x9b1   :  { %v2624_v60 = vpop.f32.mrf.mxu1 }
 0x9b2   :  { %v1619_v0 = vsel %vm409_vm10, %v2624_v60, -inf }
 0x9b3   :  { %v1601_v61 = vpop.f32.mrf.mxu1 }
 0x9b4   :  { %v1616_v62 = vsel %vm409_vm10, %v1601_v61, -inf }
 0x9b5   :  { %1617 = vmax.xlane.f32.xlu0 %v1616_v62 }
 0x9b9   :  { %1620 = vmax.xlane.f32.xlu0 %v1619_v0 }
 0xa22   :  { %v1615_v1 = vpop.xlane.xlu1 %1614 }
 0xa23   :  { %v1623_v2 = vsub.f32 %v2617_v54, %v1615_v1 }
 0xa24   :  { %v1612_v3 = vpop.xlane.xlu0 %1611 }
 0xa25   :  { %v1628_v4 = vmul.f32 1.442695, %v1623_v2  ;;  %v1622_v5 = vsub.f32 %v1510_v56, %v1612_v3 }
 0xa27   :  { %2770 = vpow2.f32 %v1628_v4  ;;  %v1626_v6 = vmul.f32 1.442695, %v1622_v5 }
 0xa29   :  { %2772 = vpow2.f32 %v1626_v6 }
 0xa34   :  { %v2771_v7 = vpop.eup %2770 }
 0xa35   :  { %v1637_v8 = vsel %vm409_vm10, %v2771_v7, 0.0 }
 0xa36   :  { %v2773_v9 = vpop.eup %2772  ;;  %1638 = vadd.xlane.f32.xlu1 %v1637_v8  ;;  %v3170_v8 = vld [vmem:[%s3292_s3] sm:$0xff] }
 0xa37   :  { %v1634_v10 = vsel %vm409_vm10, %v2773_v9, 0.0 }
 0xa38   :  { %1635 = vadd.xlane.f32.xlu0 %v1634_v10 }
 0xa3e   :  { %v1618_v11 = vpop.xlane.xlu0 %1617 }
 0xa3f   :  { %v1624_v14 = vsub.f32 %v1601_v61, %v1618_v11 }
 0xa41   :  { %v1630_v15 = vmul.f32 1.442695, %v1624_v14 }
 0xa42   :  { %v1621_v16 = vpop.xlane.xlu0 %1620 }
 0xa43   :  { %2774 = vpow2.f32 %v1630_v15  ;;  %v1625_v17 = vsub.f32 %v2624_v60, %v1621_v16  ;;  %v2804_v16 = vld [vmem:[%s3289_s0] sm:$0xff] }
 0xa45   :  { %v1632_v18 = vmul.f32 1.442695, %v1625_v17 }
 0xa47   :  { %2776 = vpow2.f32 %v1632_v18 }
 0xa50   :  { %v2775_v19 = vpop.eup %2774 }
 0xa51   :  { %v1640_v22 = vsel %vm409_vm10, %v2775_v19, 0.0 }
 0xa52   :  { %1641 = vadd.xlane.f32.xlu0 %v1640_v22 }
 0xa54   :  { %v2777_v23 = vpop.eup %2776 }
 0xa55   :  { %v1643_v24 = vsel %vm409_vm10, %v2777_v23, 0.0 }
 0xa56   :  { %1644 = vadd.xlane.f32.xlu1 %v1643_v24 }
 0xa67   :  { %1654 = vrot.lane.b32.xlu1 %v2953_v33, %s2839_s17 }
 0xa68   :  { %1656 = vrot.lane.b32.xlu0 %v2951_v27, %s2839_s17 }
 0xa6b   :  { %1743 = vrot.lane.b32.xlu1 %v2959_v35, %s2839_s17 }
 0xa6c   :  { %1899 = vrot.lane.b32.xlu0 %v2910_v28, %s2840_s18 }
 0xa6f   :  { %1741 = vrot.lane.b32.xlu1 %v2961_v36, %s2839_s17 }
 0xa70   :  { %1832 = vrot.lane.b32.xlu0 %v3069_v40, %s2841_s19 }
 0xa73   :  { %1897 = vrot.lane.b32.xlu1 %v2915_v29, %s2840_s18 }
 0xa74   :  { %1834 = vrot.lane.b32.xlu0 %v3067_v39, %s2841_s19 }
 0xa77   :  { %1895 = vrot.lane.b32.xlu1 %v2922_v30, %s2840_s18 }
 0xa78   :  { %1850 = vrot.lane.b32.xlu0 %v2603_v52, %s2842_s20 }
 0xa7b   :  { %1848 = vrot.lane.b32.xlu1 %v1332_v53, %s2842_s20 }
 0xa7c   :  { %1893 = vrot.lane.b32.xlu0 %v2931_v31, %s2840_s18 }
 0xa80   :  { %1836 = vrot.lane.b32.xlu0 %v3075_v50, %s2841_s19 }
 0xa84   :  { %1852 = vrot.lane.b32.xlu0 %v1419_v59, %s2842_s20 }
 0xabf   :  { %v1639_v33 = vpop.xlane.xlu1 %1638 }
 0xac1   :  { %v1636_v28 = vpop.xlane.xlu0 %1635 }
 0xac2   :  { %2778 = vrcp.f32 %v1636_v28  ;;  %v2805_v28 = vld [vmem:[%s3289_s0 + $0x18] sm:$0xff] }
 0xac3   :  { %2780 = vrcp.f32 %v1639_v33 }
 0xacf   :  { %v2779_v29 = vpop.eup %2778 }
 0xad0   :  { %v1650_v27 = vmul.f32 %v2779_v29, %v2773_v9  ;;  %v2781_v31 = vpop.eup %2780 }
 0xad1   :  { %v1651_v50 = vmul.f32 %v2781_v31, %v2771_v7 }
 0xad2   :  { %2629 = vmatprep.mubr.msk.f32.mxu0 %vm409_vm10, %v1650_v27  ;;  %v2806_v27 = vld [vmem:[%s3289_s0 + $0x10] sm:$0xff] }
 0xadb   :  { %v1642_v30 = vpop.xlane.xlu0 %1641 }
 0xadc   :  { %2782 = vrcp.f32 %v1642_v30 }
 0xadf   :  { %v1645_v35 = vpop.xlane.xlu1 %1644  ;;  %v1657_v36 = vpop.permute.xlu0 %1656 }
 0xae0   :  { %2784 = vrcp.f32 %v1645_v35  ;;  %2625 = vmatprep.subr.mxu0 %v1657_v36 }
 0xae1   :  { %2626 = vmatpush3.msra.mxu0 %v1657_v36 }
 0xae3   :  { %v1655_v39 = vpop.permute.xlu1 %1654  ;;  %v1900_v40 = vpop.permute.xlu0 %1899 }
 0xae4   :  { %2627 = vmatprep.subr.mxu0 %v1655_v39 }
 0xae5   :  { %2628 = vmatpush3.msra.mxu0 %v1655_v39 }
 0xae6   :  { %2630 = vmatmul.mubr.msk.f32.vlgmr.msra.gmra.mxu0 %vm409_vm10, %v1651_v50  ;;  %2639 = vmatprep.subr.mxu0 %v1900_v40 }
 0xae7   :  { %v1744_v12 = vpop.permute.xlu1 %1743  ;;  %v1833_v25 = vpop.permute.xlu0 %1832  ;;  %2640 = vmatpush3.msra.mxu0 %v1900_v40 }
 0xae8   :  { %2632 = vmatprep.subr.mxu1 %v1744_v12  ;;  %v1876_v55 = vsel %vm236_vm9, %v3027_v43, %v1833_v25 }
 0xae9   :  { %v2783_v20 = vpop.eup %2782  ;;  %2633 = vmatpush3.msra.mxu1 %v1744_v12 }
 0xaea   :  { %v1652_v13 = vmul.f32 %v2783_v20, %v2775_v19 }
 0xaeb   :  { %v1742_v26 = vpop.permute.xlu1 %1741  ;;  %v1835_v32 = vpop.permute.xlu0 %1834 }
 0xaec   :  { %2634 = vmatprep.subr.mxu1 %v1742_v26  ;;  %2636 = vmatprep.mubr.msk.f32.mxu1 %vm409_vm10, %v1652_v13  ;;  %v1877_v37 = vsel %vm236_vm9, %v3025_v42, %v1835_v32 }
 0xaed   :  { %v2785_v21 = vpop.eup %2784  ;;  %2635 = vmatpush3.msra.mxu1 %v1742_v26 }
 0xaee   :  { %v1653_v34 = vmul.f32 %v2785_v21, %v2777_v23 }
 0xaef   :  { %v1898_v38 = vpop.permute.xlu1 %1897  ;;  %v1851_v41 = vpop.permute.xlu0 %1850 }
 0xaf0   :  { %v1881_v46 = vsel %vm409_vm10, %v1877_v37, %v1851_v41  ;;  %2637 = vmatmul.mubr.msk.f32.vlgmr.msra.gmra.mxu1 %vm409_vm10, %v1653_v34  ;;  %2641 = vmatprep.subr.mxu0 %v1898_v38 }
 0xaf1   :  { %2642 = vmatpush3.msra.mxu0 %v1898_v38 }
 0xaf3   :  { %v1896_v47 = vpop.permute.xlu1 %1895  ;;  %v1894_v48 = vpop.permute.xlu0 %1893 }
 0xaf4   :  { %2643 = vmatprep.subr.mxu0 %v1896_v47 }
 0xaf5   :  { %2644 = vmatpush3.msra.mxu0 %v1896_v47 }
 0xaf6   :  { %2645 = vmatprep.subr.mxu0 %v1894_v48 }
 0xaf7   :  { %2646 = vmatpush3.msra.mxu0 %v1894_v48  ;;  %v1849_v54 = vpop.permute.xlu1 %1848  ;;  %v1837_v57 = vpop.permute.xlu0 %1836 }
 0xaf8   :  { %v1880_v56 = vsel %vm409_vm10, %v1876_v55, %v1849_v54  ;;  %v1878_v0 = vsel %vm236_vm9, %v3031_v45, %v1837_v57  ;;  %v2008_v45 = vsub.s32 1, %v2935_v63  ;;  %v27_v54 = vld [vmem:[%s3290_s1 + $0x28] sm:$0xff]  ;;  %v25_v55 = vld [vmem:[%s3290_s1 + $0x18] sm:$0xff] }
 0xaf9   :  { %v2222_v57 = vld [vmem:[%s3291_s2 + $0x38] sm:$0xff] }
 0xafa   :  { %v2009_v9 = vrot.slane %v3170_v8, %v2008_v45  ;;  %2667 = vmatprep.subr.mxu0 %v2222_v57 }
 0xafb   :  { %v1853_v62 = vpop.permute.xlu0 %1852 }
 0xafc   :  { %v1882_v43 = vsel %vm409_vm10, %v1878_v0, %v1853_v62 }
 0xba6   :  { %v2631_v51 = vpop.f32.mrf.mxu0 }
 0xba8   :  { %v1732_v52 = vpop.f32.mrf.mxu0 }
 0xba9   :  { %1864 = vrot.lane.b32.xlu1 %v1732_v52, %s2843_s21 }
 0xbad   :  { %1866 = vrot.lane.b32.xlu1 %v2631_v51, %s2843_s21 }
 0xbb0   :  { %v2638_v42 = vpop.f32.mrf.mxu1 }
 0xbb1   :  { %1838 = vrot.lane.b32.xlu1 %v3073_v49, %s2841_s19 }
 0xbb2   :  { %v1819_v53 = vpop.f32.mrf.mxu1 }
 0xbb3   :  { %1868 = vrot.lane.b32.xlu0 %v1819_v53, %s2843_s21  ;;  %v29_v53 = vld [vmem:[%s3290_s1 + $0x38] sm:$0xff] }
 0xbb4   :  { %2653 = vmatprep.subr.mxu1 %v29_v53 }
 0xbb5   :  { %1854 = vrot.lane.b32.xlu1 %v3113_v58, %s2842_s20  ;;  %2654 = vmatpush3.msra.mxu1 %v29_v53 }
 0xbb6   :  { %2655 = vmatprep.subr.mxu1 %v27_v54 }
 0xbb7   :  { %2656 = vmatpush3.msra.mxu1 %v27_v54 }
 0xbb8   :  { %2657 = vmatprep.subr.mxu1 %v25_v55 }
 0xbb9   :  { %1870 = vrot.lane.b32.xlu1 %v2638_v42, %s2843_s21  ;;  %2658 = vmatpush3.msra.mxu1 %v25_v55 }
 0xc1b   :  { %v1865_v59 = vpop.permute.xlu1 %1864 }
 0xc1c   :  { %v1885_v60 = vsel %vm1884_vm11, %v1880_v56, %v1865_v59  ;;  %v23_v56 = vld [vmem:[%s3290_s1 + $0x8] sm:$0xff]  ;;  %v2221_v59 = vld [vmem:[%s3291_s2 + $0x30] sm:$0xff] }
 0xc1d   :  { %2647 = vmatprep.mubr.msk.f32.mxu0 %vm31_vm0, %v1885_v60  ;;  %2659 = vmatprep.subr.mxu1 %v23_v56  ;;  %v2220_v60 = vld [vmem:[%s3291_s2 + $0x28] sm:$0xff] }
 0xc1e   :  { %2660 = vmatpush3.msra.mxu1 %v23_v56 }
 0xc1f   :  { %v1867_v49 = vpop.permute.xlu1 %1866 }
 0xc20   :  { %v1886_v61 = vsel %vm1884_vm11, %v1881_v46, %v1867_v49  ;;  %v2219_v49 = vld [vmem:[%s3291_s2 + $0x20] sm:$0xff] }
 0xc21   :  { %2648 = vmatmul.mubr.msk.f32.vlgmr.msra.gmra.mxu0 %vm31_vm0, %v1886_v61 }
 0xc22   :  { %2668 = vmatpush3.msra.mxu0 %v2222_v57  ;;  %v2218_v57 = vld [vmem:[%s3291_s2 + $0x18] sm:$0xff] }
 0xc23   :  { %v1839_v58 = vpop.permute.xlu1 %1838  ;;  %2669 = vmatprep.subr.mxu0 %v2221_v59 }
 0xc24   :  { %v1879_v4 = vsel %vm236_vm9, %v3029_v44, %v1839_v58  ;;  %v2803_v44 = vld [vmem:[%s3289_s0 + $0x8] sm:$0xff]  ;;  %2670 = vmatpush3.msra.mxu0 %v2221_v59  ;;  %v2215_v59 = vld [vmem:[%s3291_s2] sm:$0xff] }
 0xc25   :  { %v1869_v1 = vpop.permute.xlu0 %1868  ;;  %2671 = vmatprep.subr.mxu0 %v2220_v60 }
 0xc26   :  { %v1887_v2 = vsel %vm1884_vm11, %v1882_v43, %v1869_v1  ;;  %2672 = vmatpush3.msra.mxu0 %v2220_v60  ;;  %v2112_v60 = vsub.s32 2, %v2935_v63 }
 0xc27   :  { %v1855_v3 = vpop.permute.xlu1 %1854  ;;  %2650 = vmatprep.mubr.msk.f32.mxu0 %vm31_vm0, %v1887_v2  ;;  %2673 = vmatprep.subr.mxu0 %v2219_v49 }
 0xc28   :  { %v1883_v5 = vsel %vm409_vm10, %v1879_v4, %v1855_v3  ;;  %2674 = vmatpush3.msra.mxu0 %v2219_v49  ;;  %v2113_v49 = vrot.slane %v3170_v8, %v2112_v60 }
 0xc29   :  { %2675 = vmatprep.subr.mxu0 %v2218_v57 }
 0xc2a   :  { %2676 = vmatpush3.msra.mxu0 %v2218_v57 }
 0xc2b   :  { %v1871_v6 = vpop.permute.xlu1 %1870 }
 0xc2c   :  { %v1888_v7 = vsel %vm1884_vm11, %v1883_v5, %v1871_v6 }
 0xc2d   :  { %2651 = vmatmul.mubr.msk.f32.gmra.mxu0 %vm31_vm0, %v1888_v7 }
 0xce1   :  { %v2649_v10 = vpop.f32.mrf.mxu0 }
 0xce2   :  { %v2003_v11 = vadd.f32 %v2803_v44, %v2649_v10 }
 0xce3   :  { %v1983_v14 = vpop.f32.mrf.mxu0 }
 0xce4   :  { %v3176_v15 = vadd.f32 %v2009_v9, %v2003_v11  ;;  %v2002_v17 = vadd.f32 %v2804_v16, %v1983_v14 }
 0xce6   :  { %v3181_v18 = vadd.f32 %v2009_v9, %v2002_v17  ;;  %v2017_v19 = vsel %vm31_vm0, %v3176_v15, 0.0 }
 0xce7   :  { %2018 = vadd.xlane.f32.xlu1 %v2017_v19 }
 0xce8   :  { %v2014_v22 = vsel %vm31_vm0, %v3181_v18, 0.0 }
 0xce9   :  { %2015 = vadd.xlane.f32.xlu0 %v2014_v22 }
 0xced   :  { %v2652_v23 = vpop.f32.mrf.mxu0 }
 0xcee   :  { %v2005_v29 = vadd.f32 %v2805_v28, %v2652_v23 }
 0xcef   :  { %v1993_v24 = vpop.f32.mrf.mxu0 }
 0xcf0   :  { %v2004_v33 = vadd.f32 %v2806_v27, %v1993_v24  ;;  %v3195_v35 = vadd.f32 %v2009_v9, %v2005_v29  ;;  %v2096_v24 = vsub.s32 6, %v2935_v63 }
 0xcf2   :  { %v3193_v30 = vadd.f32 %v2009_v9, %v2004_v33  ;;  %v2023_v31 = vsel %vm31_vm0, %v3195_v35, 0.0 }
 0xcf4   :  { %v2020_v36 = vsel %vm31_vm0, %v3193_v30, 0.0 }
 0xcf5   :  { %2021 = vadd.xlane.f32.xlu0 %v2020_v36 }
 0xcf9   :  { %2024 = vadd.xlane.f32.xlu0 %v2023_v31 }
 0xd70   :  { %v2019_v39 = vpop.xlane.xlu1 %2018 }
 0xd71   :  { %v2027_v40 = vmul.f32 0.03125, %v2019_v39 }
 0xd72   :  { %v2016_v50 = vpop.xlane.xlu0 %2015 }
 0xd73   :  { %v3202_v12 = vsub.f32 %v3176_v15, %v2027_v40  ;;  %v2026_v25 = vmul.f32 0.03125, %v2016_v50  ;;  %v2097_v40 = vrot.slane %v3170_v8, %v2096_v24  ;;  %v2104_v50 = vsub.s32 7, %v2935_v63 }
 0xd75   :  { %v3205_v20 = vsub.f32 %v3181_v18, %v2026_v25  ;;  %v2035_v13 = vmul.f32 %v3202_v12, %v3202_v12 }
 0xd77   :  { %v2041_v26 = vsel %vm31_vm0, %v2035_v13, 0.0  ;;  %v2034_v32 = vmul.f32 %v3205_v20, %v3205_v20 }
 0xd78   :  { %2042 = vadd.xlane.f32.xlu1 %v2041_v26 }
 0xd79   :  { %v2038_v21 = vsel %vm31_vm0, %v2034_v32, 0.0 }
 0xd7a   :  { %2039 = vadd.xlane.f32.xlu0 %v2038_v21 }
 0xd7e   :  { %v2022_v34 = vpop.xlane.xlu0 %2021 }
 0xd7f   :  { %v2028_v37 = vmul.f32 0.03125, %v2022_v34 }
 0xd81   :  { %v3214_v38 = vsub.f32 %v3193_v30, %v2028_v37  ;;  %v2105_v37 = vrot.slane %v3170_v8, %v2104_v50 }
 0xd82   :  { %v2025_v41 = vpop.xlane.xlu0 %2024 }
 0xd83   :  { %v2029_v46 = vmul.f32 0.03125, %v2025_v41  ;;  %v2036_v47 = vmul.f32 %v3214_v38, %v3214_v38 }
 0xd85   :  { %v3219_v48 = vsub.f32 %v3195_v35, %v2029_v46  ;;  %v2044_v51 = vsel %vm31_vm0, %v2036_v47, 0.0 }
 0xd86   :  { %2045 = vadd.xlane.f32.xlu0 %v2044_v51 }
 0xd87   :  { %v2037_v52 = vmul.f32 %v3219_v48, %v3219_v48 }
 0xd89   :  { %v2047_v42 = vsel %vm31_vm0, %v2037_v52, 0.0 }
 0xd8a   :  { %2048 = vadd.xlane.f32.xlu1 %v2047_v42 }
 0xe01   :  { %v2043_v61 = vpop.xlane.xlu1 %2042 }
 0xe02   :  { %v2051_v62 = vmul.f32 0.032258064, %v2043_v61 }
 0xe03   :  { %v2040_v58 = vpop.xlane.xlu0 %2039 }
 0xe04   :  { %2786 = vrsqrt.f32 %v2051_v62  ;;  %v2050_v0 = vmul.f32 0.032258064, %v2040_v58  ;;  %vm2063_vm12 = vcmp.eq.f32.partialorder %v2051_v62, inf  ;;  %v2066_v4 = vand.u32 2147483648, %v2051_v62 }
 0xe05   :  { %vm2065_vm13 = vcmp.eq.f32.partialorder %v2051_v62, 0.0 }
 0xe06   :  { %2788 = vrsqrt.f32 %v2050_v0  ;;  %vm2056_vm14 = vcmp.eq.f32.partialorder %v2050_v0, inf  ;;  %v2059_v11 = vand.u32 2147483648, %v2050_v0  ;;  %vm2058_vm15 = vcmp.eq.f32.partialorder %v2050_v0, 0.0 }
 0xe0f   :  { %v2046_v43 = vpop.xlane.xlu0 %2045 }
 0xe10   :  { %v2052_v1 = vmul.f32 0.032258064, %v2046_v43 }
 0xe11   :  { %v2787_v2 = vpop.eup %2786 }
 0xe12   :  { %v2062_v3 = vmul.f32 %v2787_v2, %v2051_v62  ;;  %2790 = vrsqrt.f32 %v2052_v1  ;;  %vm2070_vm1 = vcmp.eq.f32.partialorder %v2052_v1, inf  ;;  %v2073_v23 = vand.u32 2147483648, %v2052_v1 }
 0xe13   :  { %v2049_v5 = vpop.xlane.xlu1 %2048  ;;  %v2789_v6 = vpop.eup %2788  ;;  %vm2072_vm2 = vcmp.eq.f32.partialorder %v2052_v1, 0.0 }
 0xe14   :  { %v2064_v7 = vsel %vm2063_vm12, %v2051_v62, %v2062_v3  ;;  %v2053_v45 = vmul.f32 0.032258064, %v2049_v5  ;;  %v2055_v10 = vmul.f32 %v2789_v6, %v2050_v0 }
 0xe15   :  { %v2067_v9 = vsel %vm2065_vm13, %v2066_v4, %v2064_v7 }
 0xe16   :  { %v2083_v44 = vadd.f32 1e-06, %v2067_v9  ;;  %2792 = vrsqrt.f32 %v2053_v45  ;;  %v2057_v14 = vsel %vm2056_vm14, %v2050_v0, %v2055_v10  ;;  %vm2077_vm3 = vcmp.eq.f32.partialorder %v2053_v45, inf }
 0xe17   :  { %v2060_v16 = vsel %vm2058_vm15, %v2059_v11, %v2057_v14  ;;  %v2080_v39 = vand.u32 2147483648, %v2053_v45  ;;  %vm2079_vm4 = vcmp.eq.f32.partialorder %v2053_v45, 0.0 }
 0xe18   :  { %2794 = vrcp.f32 %v2083_v44  ;;  %v2082_v17 = vadd.f32 1e-06, %v2060_v16 }
 0xe1a   :  { %2796 = vrcp.f32 %v2082_v17 }
 0xe1f   :  { %v2791_v19 = vpop.eup %2790 }
 0xe20   :  { %v2069_v22 = vmul.f32 %v2791_v19, %v2052_v1 }
 0xe22   :  { %v2071_v28 = vsel %vm2070_vm1, %v2052_v1, %v2069_v22 }
 0xe23   :  { %v2793_v29 = vpop.eup %2792  ;;  %v2074_v27 = vsel %vm2072_vm2, %v2073_v23, %v2071_v28 }
 0xe24   :  { %v2084_v33 = vadd.f32 1e-06, %v2074_v27  ;;  %v2076_v36 = vmul.f32 %v2793_v29, %v2053_v45 }
 0xe25   :  { %v2795_v31 = vpop.eup %2794 }
 0xe26   :  { %2798 = vrcp.f32 %v2084_v33  ;;  %v2078_v25 = vsel %vm2077_vm3, %v2053_v45, %v2076_v36  ;;  %v2089_v13 = vmul.f32 %v2795_v31, %v3202_v12  ;;  %v2225_v45 = vsub.s32 3, %v2935_v63 }
 0xe27   :  { %v2081_v26 = vsel %vm2079_vm4, %v2080_v39, %v2078_v25  ;;  %v2797_v32 = vpop.eup %2796 }
 0xe28   :  { %v2085_v21 = vadd.f32 1e-06, %v2081_v26  ;;  %v2087_v34 = vmul.f32 %v2797_v32, %v3205_v20  ;;  %v2099_v41 = vmul.f32 %v2097_v40, %v2089_v13  ;;  %v2226_v9 = vrot.slane %v3170_v8, %v2225_v45 }
 0xe2a   :  { %2800 = vrcp.f32 %v2085_v21  ;;  %v2098_v46 = vmul.f32 %v2097_v40, %v2087_v34  ;;  %v2107_v51 = vadd.f32 %v2105_v37, %v2099_v41 }
 0xe2c   :  { %v2106_v47 = vadd.f32 %v2105_v37, %v2098_v46 }
 0xe2e   :  { %2661 = vmatprep.mubr.msk.f32.mxu1 %vm31_vm0, %v2106_v47 }
 0xe2f   :  { %2662 = vmatmul.mubr.msk.f32.vlgmr.msra.gmra.mxu1 %vm31_vm0, %v2107_v51 }
 0xe33   :  { %v2799_v52 = vpop.eup %2798 }
 0xe34   :  { %v2091_v42 = vmul.f32 %v2799_v52, %v3214_v38  ;;  %v2217_v38 = vld [vmem:[%s3291_s2 + $0x10] sm:$0xff] }
 0xe35   :  { %2677 = vmatprep.subr.mxu0 %v2217_v38 }
 0xe36   :  { %v2100_v12 = vmul.f32 %v2097_v40, %v2091_v42  ;;  %2678 = vmatpush3.msra.mxu0 %v2217_v38 }
 0xe37   :  { %v2801_v53 = vpop.eup %2800 }
 0xe38   :  { %v2108_v54 = vadd.f32 %v2105_v37, %v2100_v12  ;;  %v2093_v55 = vmul.f32 %v2801_v53, %v3219_v48  ;;  %v2216_v48 = vld [vmem:[%s3291_s2 + $0x8] sm:$0xff]  ;;  %s2844_s2 = smov [#allocation2]  }
 0xe39   :  { %2679 = vmatprep.subr.mxu0 %v2216_v48  ;;  %s2338_s3 = sshll.u32 %s2844_s2, 4  ;;  %s2339_s3 = int_to_ptr.vmem [resolvable:$true] %s2338_s3 }
 0xe3a   :  { %2664 = vmatprep.mubr.msk.f32.mxu1 %vm31_vm0, %v2108_v54  ;;  %v2101_v20 = vmul.f32 %v2097_v40, %v2093_v55  ;;  %2680 = vmatpush3.msra.mxu0 %v2216_v48  ;;  %s2807_s28 = scalar_lea.vmem %s2339_s3, 512  ;;  %p2812_p1 = scmp.lt.s32.totalorder %s2339_s3, %s2339_s3 }
 0xe3b   :  { %2681 = vmatprep.subr.mxu0 %v2215_v59  ;;  %p2808_p0 = scmp.ne.s32.totalorder %s2339_s3, %s2807_s28  ;;  %p2813_p2 = scmp.lt.s32.totalorder %s2807_s28, %s2807_s28 }
 0xe3c   :  { %v2109_v56 = vadd.f32 %v2105_v37, %v2101_v20  ;;  %2682 = vmatpush3.msra.mxu0 %v2215_v59 }
 0xe3d   :  { %p2814_p3 = por %p2813_p2, %p2812_p1 }
 0xe3e   :  { %2665 = vmatmul.mubr.msk.f32.gmra.mxu1 %vm31_vm0, %v2109_v56 }
 0xe3f   :  { %p2815_p4 = pnand %p2814_p3, %p2808_p0 }
 0xeef   :  { %v2663_v61 = vpop.f32.mrf.mxu1 }
 0xef0   :  { %v2198_v62 = vadd.f32 %v2663_v61, %v2113_v49 }
 0xef1   :  { %v2192_v58 = vpop.f32.mrf.mxu1 }
 0xef2   :  { %v2193_v0 = vadd.f32 %v2192_v58, %v2113_v49  ;;  %v2212_v1 = vmax.f32 %v2198_v62, 0.0 }
 0xef4   :  { %v2211_v43 = vmax.f32 %v2193_v0, 0.0 }
 0xef6   :  { %2683 = vmatprep.mubr.msk.f32.mxu0 %vm2227_vm5, %v2211_v43 }
 0xef7   :  { %2684 = vmatmul.mubr.msk.f32.vlgmr.msra.gmra.mxu0 %vm2227_vm5, %v2212_v1 }
 0xefe   :  { %v2666_v2 = vpop.f32.mrf.mxu1 }
 0xeff   :  { %v2208_v3 = vadd.f32 %v2666_v2, %v2113_v49 }
 0xf00   :  { %v2202_v4 = vpop.f32.mrf.mxu1 }
 0xf01   :  { %v2203_v5 = vadd.f32 %v2202_v4, %v2113_v49  ;;  %v2214_v7 = vmax.f32 %v2208_v3, 0.0 }
 0xf03   :  { %v2213_v6 = vmax.f32 %v2203_v5, 0.0 }
 0xf05   :  { %2686 = vmatprep.mubr.msk.f32.mxu0 %vm2227_vm5, %v2213_v6 }
 0xf06   :  { %2687 = vmatmul.mubr.msk.f32.gmra.mxu0 %vm2227_vm5, %v2214_v7 }
 0xfb7   :  { %v2685_v10 = vpop.f32.mrf.mxu0 }
 0xfb8   :  { %v2312_v44 = vadd.f32 %v2685_v10, %v2226_v9 }
 0xfb9   :  { %v2306_v11 = vpop.f32.mrf.mxu0 }
 0xfba   :  { %v2326_v14 = vadd.f32 %v2312_v44, %v3176_v15  ;;  %v2307_v16 = vadd.f32 %v2306_v11, %v2226_v9 }
 0xfbc   :  { %2330 = vst.msk [vmem:[#allocation2 + $0x8] sm:$0xff] %vm31_vm0, %v2326_v14  ;;  %v2325_v17 = vadd.f32 %v2307_v16, %v3181_v18 }
 0xfbe   :  { %2329 = vst.msk [vmem:[#allocation2] sm:$0xff] %vm31_vm0, %v2325_v17 }
 0xfc6   :  { %v2688_v19 = vpop.f32.mrf.mxu0 }
 0xfc7   :  { %v2322_v22 = vadd.f32 %v2688_v19, %v2226_v9 }
 0xfc8   :  { %v2316_v23 = vpop.f32.mrf.mxu0 }
 0xfc9   :  { %v2328_v63 = vadd.f32 %v2322_v22, %v3195_v35  ;;  %v2317_v8 = vadd.f32 %v2316_v23, %v2226_v9 }
 0xfcb   :  { %2332 = vst.msk [vmem:[#allocation2 + $0x18] sm:$0xff] %vm31_vm0, %v2328_v63  ;;  %v2327_v24 = vadd.f32 %v2317_v8, %v3193_v30 }
 0xfcd   :  { %2331 = vst.msk [vmem:[#allocation2 + $0x10] sm:$0xff] %vm31_vm0, %v2327_v24 }
 0xfce   :  { %2818 = shalt.err (!%p2815_p4)
}
 0xfcf   :  { %s2845_s29 = smov 128  }
 0xfd0   :  { %2344 = dma.vmem_to_hbm [thread:$0]  %s2339_s3, 512, %s3293_s4, [#allocation3], %s2845_s29, %s2845_s29, %s2841_s19  }
 0xfd1   :  { %2827 = dma.done.wait [#allocation3], 512  }
 0xfd2   :  { %2828 = vsyncadd [#allocation3], 4294966784 }
 0xfd3   :  { %2348 = vsyncpa [#allocation3], 1 }

</bundles_post_ra>
